<compile_context>
chip_gen: v7x
topology: tpu7x:2x2x1
jax: 0.10.0
libtpu: 0.0.40
codegen_flags: <defaults>
</compile_context>

<pallas_src>
import numpy as np
import jax
import jax.numpy as jnp
from jax.experimental import pallas as pl
from jax.experimental.pallas import tpu as pltpu

# ------------------------------ layout constants ------------------------------
IMG = 28                 # input spatial size
K5 = 5                   # conv kernel size
C1 = 10                  # conv1 output channels
C2 = 20                  # conv2 output channels
H1 = IMG - K5 + 1        # 24: conv1 output size = per-image row-slab height
P1 = H1 // 2             # 12: pooled-1 spatial size
H2 = P1 - K5 + 1         # 8 : conv2 output spatial size
P2 = H2 // 2             # 4 : pooled-2 spatial size

K1 = K5 * IMG            # 140: conv1 matmul contraction width (kh-major, w minor)
BLK1 = 128               # one pooled-w conv1 grid: 12*10 = 120 lanes, padded to 128
L2IN = BLK1              # conv2 matmul K
L2BLK = H2 * C2          # 160: one kh-tap block of conv2 output lanes (w2, c2)
L2OUT = K5 * L2BLK       # 800
LFC1 = P2 * L2BLK        # 640: fc1 contraction width (4 rows x 160 lanes)
NF1 = 64                 # fc1 hidden 50 -> 64
NCLS = 128               # classes 10 -> 128 (lane-dense output tile)


# --------------------------------- the kernel ---------------------------------

def _make_kernel(n_batch):
    """Single fused forward kernel; n_batch images, 24-row slab per image."""

    def _shift_rows_up(a, k):
        # result[r] = a[r + k]; the k tail rows become zero (never consumed).
        return jnp.concatenate(
            [a[k:, :], jnp.zeros((k, a.shape[1]), a.dtype)], axis=0)

    def _shift_lanes_left(a, k):
        # result[:, l] = a[:, l + k]; the k tail lanes become zero (unused).
        return jnp.concatenate(
            [a[:, k:], jnp.zeros((a.shape[0], k), a.dtype)], axis=1)

    def kernel(x_ref, w1_ref, b1_ref, w2_ref, b2_ref,
               wf1_ref, bf1_ref, wf2_ref, bf2_ref, o_ref):
        # ---- conv1: in-kernel "im2col-lite" (5 kh slabs on lanes), 1 matmul --
        imgs = [x_ref[n] for n in range(n_batch)]                  # (28, 28) f32
        lhs1 = jnp.concatenate(
            [jnp.concatenate([img[kh:kh + H1, :] for img in imgs], axis=0)
             for kh in range(K5)], axis=1).astype(jnp.bfloat16)    # (N*24, 140)
        y1 = jnp.dot(lhs1, w1_ref[...],
                     preferred_element_type=jnp.float32)           # (N*24, 256)

        # 2x2 max pool: w offsets are the two 128-lane blocks of the banded
        # weight, h is a one-row shift; bias + relu after the pool (equivalent).
        y1 = jnp.maximum(y1[:, :BLK1], y1[:, BLK1:])               # pool over w
        y1 = jnp.maximum(y1, _shift_rows_up(y1, 1))                # pool over h
        act1 = jnp.maximum(y1 + b1_ref[...], 0.0).astype(jnp.bfloat16)  # (N*24,128)

        # ---- conv2: one K=128 matmul, then the 5 kh taps as shifted adds ----
        z2 = jnp.dot(act1, w2_ref[...],
                     preferred_element_type=jnp.float32)           # (N*24, 800)
        y2 = z2[:, :L2BLK]
        for kh in range(1, K5):
            y2 = y2 + _shift_rows_up(z2[:, kh * L2BLK:(kh + 1) * L2BLK], 2 * kh)

        # 2x2 max pool (rows at stride 2, lanes at stride 20) + bias + relu
        y2 = jnp.maximum(y2, _shift_rows_up(y2, 2))
        y2 = jnp.maximum(y2, _shift_lanes_left(y2, C2))
        act2 = jnp.maximum(y2 + b2_ref[...], 0.0)                  # (N*24, 160) f32

        # ---- fc1: gather the 4 valid pooled rows per image, one K=640 matmul
        feats = []
        for n in range(n_batch):
            rows = [act2[n * H1 + 4 * h3:n * H1 + 4 * h3 + 1, :]
                    for h3 in range(P2)]
            feats.append(jnp.concatenate(rows, axis=1))            # (1, 640)
        fvec = jnp.concatenate(feats, axis=0).astype(jnp.bfloat16)  # (N, 640)
        h = jnp.dot(fvec, wf1_ref[...],
                    preferred_element_type=jnp.float32) + bf1_ref[...]
        h = jnp.maximum(h, 0.0)                                    # (N, 64)

        # ---- fc2 + log_softmax over dim 0 (the batch), as in the PyTorch spec
        z = jnp.dot(h.astype(jnp.bfloat16), wf2_ref[...],
                    preferred_element_type=jnp.float32) + bf2_ref[...]
        mx = jnp.max(z, axis=0, keepdims=True)
        lse = jnp.log(jnp.sum(jnp.exp(z - mx), axis=0, keepdims=True)) + mx
        o_ref[...] = z - lse

    return kernel


# --------------------------- host-side weight prep ----------------------------

def prepare_params(params):
    """Repack PyTorch-layout weights into banded, matmul-ready operands."""
    w1 = np.asarray(params["conv1_w"], np.float32).reshape(C1, K5, K5)
    b1 = np.asarray(params["conv1_b"], np.float32)
    w2 = np.asarray(params["conv2_w"], np.float32)                 # (20, 10, 5, 5)
    b2 = np.asarray(params["conv2_b"], np.float32)
    f1 = np.asarray(params["fc1_w"], np.float32)                   # (50, 320)
    g1 = np.asarray(params["fc1_b"], np.float32)
    f2 = np.asarray(params["fc2_w"], np.float32)                   # (10, 50)
    g2 = np.asarray(params["fc2_b"], np.float32)

    # conv1 banded weight: row = kh*28 + w, col = pool-dx*128 + w1*10 + c
    W1 = np.zeros((K1, 2 * BLK1), np.float32)
    for kh in range(K5):
        for w1i in range(P1):
            for dx in range(2):
                for kw in range(K5):
                    w = 2 * w1i + dx + kw
                    c0 = dx * BLK1 + w1i * C1
                    W1[kh * IMG + w, c0:c0 + C1] = w1[:, kh, kw]
    b1row = np.zeros((1, BLK1), np.float32)
    for w1i in range(P1):
        b1row[0, w1i * C1:(w1i + 1) * C1] = b1

    # conv2 banded weight: row = w1*10 + c1, col = kh*160 + w2*20 + c2
    W2 = np.zeros((L2IN, L2OUT), np.float32)
    for w1i in range(P1):
        for c1 in range(C1):
            r = w1i * C1 + c1
            for kh in range(K5):
                for w2i in range(H2):
                    kw = w1i - w2i
                    if 0 <= kw < K5:
                        col = kh * L2BLK + w2i * C2
                        W2[r, col:col + C2] = w2[:, c1, kh, kw]
    b2row = np.zeros((1, L2BLK), np.float32)
    for w2i in range(H2):
        b2row[0, w2i * C2:(w2i + 1) * C2] = b2

    # fc1: valid features sit at lanes (2*w3)*20 + c2 of rows h3 in {0..3};
    # PyTorch flattening order of the 320 features is (c2, h3, w3).
    Wf1 = np.zeros((LFC1, NF1), np.float32)
    for h3 in range(P2):
        for w3 in range(P2):
            for c2 in range(C2):
                r = h3 * L2BLK + (2 * w3) * C2 + c2
                Wf1[r, :50] = f1[:, c2 * (P2 * P2) + h3 * P2 + w3]
    bf1row = np.zeros((1, NF1), np.float32)
    bf1row[0, :50] = g1

    Wf2 = np.zeros((NF1, NCLS), np.float32)
    Wf2[:50, :10] = f2.T
    bf2row = np.zeros((1, NCLS), np.float32)
    bf2row[0, :10] = g2

    bf16 = jnp.bfloat16
    return {
        "w1": jnp.asarray(W1, bf16), "b1": jnp.asarray(b1row),
        "w2": jnp.asarray(W2, bf16), "b2": jnp.asarray(b2row),
        "wf1": jnp.asarray(Wf1, bf16), "bf1": jnp.asarray(bf1row),
        "wf2": jnp.asarray(Wf2, bf16), "bf2": jnp.asarray(bf2row),
    }


# --------------------------------- forward pass --------------------------------

def _full_spec(shape):
    if len(shape) == 3:
        return pl.BlockSpec(shape, lambda i: (0, 0, 0))
    return pl.BlockSpec(shape, lambda i: (0, 0))


def net_forward(x_nchw, prep):
    n = x_nchw.shape[0]
    assert x_nchw.shape[1:] == (1, IMG, IMG) and 1 <= n <= 16
    x = x_nchw.reshape(n, IMG, IMG)          # free reshape; raw pixels go in

    m = n * H1
    flops = 2 * (m * K1 * 2 * BLK1 + m * L2IN * L2OUT
                 + n * LFC1 * NF1 + n * NF1 * NCLS)
    operands = (x, prep["w1"], prep["b1"], prep["w2"], prep["b2"],
                prep["wf1"], prep["bf1"], prep["wf2"], prep["bf2"])
    bytes_accessed = sum(int(a.size) * a.dtype.itemsize for a in operands) \
        + n * NCLS * 4

    out = pl.pallas_call(
        _make_kernel(n),
        grid=(1,),
        in_specs=[_full_spec(a.shape) for a in operands],
        out_specs=_full_spec((n, NCLS)),
        out_shape=jax.ShapeDtypeStruct((n, NCLS), jnp.float32),
        compiler_params=pltpu.CompilerParams(dimension_semantics=("arbitrary",)),
        cost_estimate=pl.CostEstimate(flops=flops,
                                      transcendentals=(n + 1) * NCLS,
                                      bytes_accessed=bytes_accessed),
    )(*operands)
    return out[:, :10]


# ------------------------------ pure-JAX reference -----------------------------

def _ref_forward(x, params):
    def conv(h, w, b):
        y = jax.lax.conv_general_dilated(h, w, (1, 1), "VALID",
                                         dimension_numbers=("NCHW", "OIHW", "NCHW"))
        return y + b.reshape(1, -1, 1, 1)

    def maxpool2(h):
        return jax.lax.reduce_window(h, -jnp.inf, jax.lax.max,
                                     (1, 1, 2, 2), (1, 1, 2, 2), "VALID")

    h = jax.nn.relu(maxpool2(conv(x, params["conv1_w"], params["conv1_b"])))
    h = jax.nn.relu(maxpool2(conv(h, params["conv2_w"], params["conv2_b"])))
    h = h.reshape(h.shape[0], -1)
    h = jax.nn.relu(h @ params["fc1_w"].T + params["fc1_b"])
    z = h @ params["fc2_w"].T + params["fc2_b"]
    return jax.nn.log_softmax(z, axis=0)    # dim=0, exactly as in the PyTorch Net


# -------------------------------------- main -----------------------------------

if __name__ == "__main__":
    key = jax.random.PRNGKey(0)
    ks = jax.random.split(key, 9)
    N = 2
    # 28x28 single-channel input is required by the architecture (20*4*4 == 320)
    x = jax.random.normal(ks[0], (N, 1, 28, 28), jnp.float32)

    params = {
        "conv1_w": 0.10 * jax.random.normal(ks[1], (10, 1, 5, 5), jnp.float32),
        "conv1_b": 0.10 * jax.random.normal(ks[2], (10,), jnp.float32),
        "conv2_w": 0.10 * jax.random.normal(ks[3], (20, 10, 5, 5), jnp.float32),
        "conv2_b": 0.10 * jax.random.normal(ks[4], (20,), jnp.float32),
        "fc1_w": 0.05 * jax.random.normal(ks[5], (50, 320), jnp.float32),
        "fc1_b": 0.05 * jax.random.normal(ks[6], (50,), jnp.float32),
        "fc2_w": 0.05 * jax.random.normal(ks[7], (10, 50), jnp.float32),
        "fc2_b": 0.05 * jax.random.normal(ks[8], (10,), jnp.float32),
    }

    prep = prepare_params(params)            # one-time weight repacking
    fwd = jax.jit(net_forward)

    out = jax.block_until_ready(fwd(x, prep))
    assert out.shape == (N, 10) and out.dtype == jnp.float32

    ref = jax.block_until_ready(_ref_forward(x, params))
    # bf16 MXU operands (f32 accumulation) => slightly looser tolerance than f32
    assert jnp.allclose(out, ref, rtol=2e-2, atol=2e-2), (
        "mismatch vs. JAX reference: max|diff|=%g"
        % float(jnp.max(jnp.abs(out - ref))))

    print("KERNEL_OK")
</pallas_src>

<mosaic_0001>
module attributes {stable_mosaic.version = 11 : i64} {
  func.func @kernel(%arg0: i32, %arg1: memref<2x28x28xf32, #tpu.memory_space<vmem>>, %arg2: memref<140x256xbf16, #tpu.memory_space<vmem>>, %arg3: memref<1x128xf32, #tpu.memory_space<vmem>>, %arg4: memref<128x800xbf16, #tpu.memory_space<vmem>>, %arg5: memref<1x160xf32, #tpu.memory_space<vmem>>, %arg6: memref<640x64xbf16, #tpu.memory_space<vmem>>, %arg7: memref<1x64xf32, #tpu.memory_space<vmem>>, %arg8: memref<64x128xbf16, #tpu.memory_space<vmem>>, %arg9: memref<1x128xf32, #tpu.memory_space<vmem>>, %arg10: memref<2x128xf32, #tpu.memory_space<vmem>>) attributes {dimension_semantics = [#tpu.dimension_semantics<arbitrary>], iteration_bounds = array<i64: 1>, scalar_prefetch = 0 : i64, scratch_operands = 0 : i64, tpu.core_type = #tpu.core_type<tc>, window_params = [{pipeline_mode = #tpu.pipeline_mode<synchronous>, transform_indices = @transform_0, window_bounds = array<i64: 2, 28, 28>}, {pipeline_mode = #tpu.pipeline_mode<synchronous>, transform_indices = @transform_1, window_bounds = array<i64: 140, 256>}, {pipeline_mode = #tpu.pipeline_mode<synchronous>, transform_indices = @transform_2, window_bounds = array<i64: 1, 128>}, {pipeline_mode = #tpu.pipeline_mode<synchronous>, transform_indices = @transform_3, window_bounds = array<i64: 128, 800>}, {pipeline_mode = #tpu.pipeline_mode<synchronous>, transform_indices = @transform_4, window_bounds = array<i64: 1, 160>}, {pipeline_mode = #tpu.pipeline_mode<synchronous>, transform_indices = @transform_5, window_bounds = array<i64: 640, 64>}, {pipeline_mode = #tpu.pipeline_mode<synchronous>, transform_indices = @transform_6, window_bounds = array<i64: 1, 64>}, {pipeline_mode = #tpu.pipeline_mode<synchronous>, transform_indices = @transform_7, window_bounds = array<i64: 64, 128>}, {pipeline_mode = #tpu.pipeline_mode<synchronous>, transform_indices = @transform_8, window_bounds = array<i64: 1, 128>}, {pipeline_mode = #tpu.pipeline_mode<synchronous>, transform_indices = @transform_9, window_bounds = array<i64: 2, 128>}]} {
    %c0 = arith.constant 0 : index
    %c0_0 = arith.constant 0 : index
    %c0_1 = arith.constant 0 : index
    %0 = vector.load %arg1[%c0, %c0_0, %c0_1] : memref<2x28x28xf32, #tpu.memory_space<vmem>>, vector<1x28x28xf32>
    %1 = vector.shape_cast %0 : vector<1x28x28xf32> to vector<28x28xf32>
    %c1 = arith.constant 1 : index
    %c0_2 = arith.constant 0 : index
    %c0_3 = arith.constant 0 : index
    %2 = vector.load %arg1[%c1, %c0_2, %c0_3] : memref<2x28x28xf32, #tpu.memory_space<vmem>>, vector<1x28x28xf32>
    %3 = vector.shape_cast %2 : vector<1x28x28xf32> to vector<28x28xf32>
    %4 = vector.extract_strided_slice %1 {offsets = [0, 0], sizes = [24, 28], strides = [1, 1]} : vector<28x28xf32> to vector<24x28xf32>
    %5 = vector.extract_strided_slice %3 {offsets = [0, 0], sizes = [24, 28], strides = [1, 1]} : vector<28x28xf32> to vector<24x28xf32>
    %6 = tpu.concatenate %4, %5 in 0 : vector<24x28xf32>, vector<24x28xf32> -> vector<48x28xf32>
    %7 = vector.extract_strided_slice %1 {offsets = [1, 0], sizes = [24, 28], strides = [1, 1]} : vector<28x28xf32> to vector<24x28xf32>
    %8 = vector.extract_strided_slice %3 {offsets = [1, 0], sizes = [24, 28], strides = [1, 1]} : vector<28x28xf32> to vector<24x28xf32>
    %9 = tpu.concatenate %7, %8 in 0 : vector<24x28xf32>, vector<24x28xf32> -> vector<48x28xf32>
    %10 = vector.extract_strided_slice %1 {offsets = [2, 0], sizes = [24, 28], strides = [1, 1]} : vector<28x28xf32> to vector<24x28xf32>
    %11 = vector.extract_strided_slice %3 {offsets = [2, 0], sizes = [24, 28], strides = [1, 1]} : vector<28x28xf32> to vector<24x28xf32>
    %12 = tpu.concatenate %10, %11 in 0 : vector<24x28xf32>, vector<24x28xf32> -> vector<48x28xf32>
    %13 = vector.extract_strided_slice %1 {offsets = [3, 0], sizes = [24, 28], strides = [1, 1]} : vector<28x28xf32> to vector<24x28xf32>
    %14 = vector.extract_strided_slice %3 {offsets = [3, 0], sizes = [24, 28], strides = [1, 1]} : vector<28x28xf32> to vector<24x28xf32>
    %15 = tpu.concatenate %13, %14 in 0 : vector<24x28xf32>, vector<24x28xf32> -> vector<48x28xf32>
    %16 = vector.extract_strided_slice %1 {offsets = [4, 0], sizes = [24, 28], strides = [1, 1]} : vector<28x28xf32> to vector<24x28xf32>
    %17 = vector.extract_strided_slice %3 {offsets = [4, 0], sizes = [24, 28], strides = [1, 1]} : vector<28x28xf32> to vector<24x28xf32>
    %18 = tpu.concatenate %16, %17 in 0 : vector<24x28xf32>, vector<24x28xf32> -> vector<48x28xf32>
    %19 = tpu.concatenate %6, %9, %12, %15, %18 in 1 : vector<48x28xf32>, vector<48x28xf32>, vector<48x28xf32>, vector<48x28xf32>, vector<48x28xf32> -> vector<48x140xf32>
    %20 = arith.truncf %19 : vector<48x140xf32> to vector<48x140xbf16>
    %c0_4 = arith.constant 0 : index
    %c0_5 = arith.constant 0 : index
    %21 = vector.load %arg2[%c0_4, %c0_5] : memref<140x256xbf16, #tpu.memory_space<vmem>>, vector<140x256xbf16>
    %cst = arith.constant dense<0.000000e+00> : vector<48x256xf32>
    %22 = tpu.matmul %20, %21, %cst {dimension_numbers = #tpu.dot_dimension_numbers<[1], [0], [0], [1], [0, 0, 1, 1], [], []>} : vector<48x140xbf16>, vector<140x256xbf16>, vector<48x256xf32> -> vector<48x256xf32>
    %23 = vector.extract_strided_slice %22 {offsets = [0, 0], sizes = [48, 128], strides = [1, 1]} : vector<48x256xf32> to vector<48x128xf32>
    %24 = vector.extract_strided_slice %22 {offsets = [0, 128], sizes = [48, 128], strides = [1, 1]} : vector<48x256xf32> to vector<48x128xf32>
    %25 = arith.maximumf %23, %24 : vector<48x128xf32>
    %26 = vector.extract_strided_slice %25 {offsets = [1, 0], sizes = [47, 128], strides = [1, 1]} : vector<48x128xf32> to vector<47x128xf32>
    %cst_6 = arith.constant 0.000000e+00 : f32
    %27 = vector.broadcast %cst_6 : f32 to vector<1x128xf32>
    %28 = tpu.concatenate %26, %27 in 0 : vector<47x128xf32>, vector<1x128xf32> -> vector<48x128xf32>
    %29 = arith.maximumf %25, %28 : vector<48x128xf32>
    %c0_7 = arith.constant 0 : index
    %c0_8 = arith.constant 0 : index
    %30 = vector.load %arg3[%c0_7, %c0_8] : memref<1x128xf32, #tpu.memory_space<vmem>>, vector<1x128xf32>
    %31 = vector.broadcast %30 : vector<1x128xf32> to vector<48x128xf32>
    %32 = arith.addf %29, %31 : vector<48x128xf32>
    %cst_9 = arith.constant 0.000000e+00 : f32
    %33 = vector.broadcast %cst_9 : f32 to vector<48x128xf32>
    %34 = arith.maximumf %32, %33 : vector<48x128xf32>
    %35 = arith.truncf %34 : vector<48x128xf32> to vector<48x128xbf16>
    %c0_10 = arith.constant 0 : index
    %c0_11 = arith.constant 0 : index
    %36 = vector.load %arg4[%c0_10, %c0_11] : memref<128x800xbf16, #tpu.memory_space<vmem>>, vector<128x800xbf16>
    %cst_12 = arith.constant dense<0.000000e+00> : vector<48x800xf32>
    %37 = tpu.matmul %35, %36, %cst_12 {dimension_numbers = #tpu.dot_dimension_numbers<[1], [0], [0], [1], [0, 0, 1, 1], [], []>} : vector<48x128xbf16>, vector<128x800xbf16>, vector<48x800xf32> -> vector<48x800xf32>
    %38 = vector.extract_strided_slice %37 {offsets = [0, 0], sizes = [48, 160], strides = [1, 1]} : vector<48x800xf32> to vector<48x160xf32>
    %39 = vector.extract_strided_slice %37 {offsets = [0, 160], sizes = [48, 160], strides = [1, 1]} : vector<48x800xf32> to vector<48x160xf32>
    %40 = vector.extract_strided_slice %39 {offsets = [2, 0], sizes = [46, 160], strides = [1, 1]} : vector<48x160xf32> to vector<46x160xf32>
    %cst_13 = arith.constant 0.000000e+00 : f32
    %41 = vector.broadcast %cst_13 : f32 to vector<2x160xf32>
    %42 = tpu.concatenate %40, %41 in 0 : vector<46x160xf32>, vector<2x160xf32> -> vector<48x160xf32>
    %43 = arith.addf %38, %42 : vector<48x160xf32>
    %44 = vector.extract_strided_slice %37 {offsets = [0, 320], sizes = [48, 160], strides = [1, 1]} : vector<48x800xf32> to vector<48x160xf32>
    %45 = vector.extract_strided_slice %44 {offsets = [4, 0], sizes = [44, 160], strides = [1, 1]} : vector<48x160xf32> to vector<44x160xf32>
    %cst_14 = arith.constant 0.000000e+00 : f32
    %46 = vector.broadcast %cst_14 : f32 to vector<4x160xf32>
    %47 = tpu.concatenate %45, %46 in 0 : vector<44x160xf32>, vector<4x160xf32> -> vector<48x160xf32>
    %48 = arith.addf %43, %47 : vector<48x160xf32>
    %49 = vector.extract_strided_slice %37 {offsets = [0, 480], sizes = [48, 160], strides = [1, 1]} : vector<48x800xf32> to vector<48x160xf32>
    %50 = vector.extract_strided_slice %49 {offsets = [6, 0], sizes = [42, 160], strides = [1, 1]} : vector<48x160xf32> to vector<42x160xf32>
    %cst_15 = arith.constant 0.000000e+00 : f32
    %51 = vector.broadcast %cst_15 : f32 to vector<6x160xf32>
    %52 = tpu.concatenate %50, %51 in 0 : vector<42x160xf32>, vector<6x160xf32> -> vector<48x160xf32>
    %53 = arith.addf %48, %52 : vector<48x160xf32>
    %54 = vector.extract_strided_slice %37 {offsets = [0, 640], sizes = [48, 160], strides = [1, 1]} : vector<48x800xf32> to vector<48x160xf32>
    %55 = vector.extract_strided_slice %54 {offsets = [8, 0], sizes = [40, 160], strides = [1, 1]} : vector<48x160xf32> to vector<40x160xf32>
    %cst_16 = arith.constant 0.000000e+00 : f32
    %56 = vector.broadcast %cst_16 : f32 to vector<8x160xf32>
    %57 = tpu.concatenate %55, %56 in 0 : vector<40x160xf32>, vector<8x160xf32> -> vector<48x160xf32>
    %58 = arith.addf %53, %57 : vector<48x160xf32>
    %59 = vector.extract_strided_slice %58 {offsets = [2, 0], sizes = [46, 160], strides = [1, 1]} : vector<48x160xf32> to vector<46x160xf32>
    %cst_17 = arith.constant 0.000000e+00 : f32
    %60 = vector.broadcast %cst_17 : f32 to vector<2x160xf32>
    %61 = tpu.concatenate %59, %60 in 0 : vector<46x160xf32>, vector<2x160xf32> -> vector<48x160xf32>
    %62 = arith.maximumf %58, %61 : vector<48x160xf32>
    %63 = vector.extract_strided_slice %62 {offsets = [0, 20], sizes = [48, 140], strides = [1, 1]} : vector<48x160xf32> to vector<48x140xf32>
    %cst_18 = arith.constant 0.000000e+00 : f32
    %64 = vector.broadcast %cst_18 : f32 to vector<48x20xf32>
    %65 = tpu.concatenate %63, %64 in 1 : vector<48x140xf32>, vector<48x20xf32> -> vector<48x160xf32>
    %66 = arith.maximumf %62, %65 : vector<48x160xf32>
    %c0_19 = arith.constant 0 : index
    %c0_20 = arith.constant 0 : index
    %67 = vector.load %arg5[%c0_19, %c0_20] : memref<1x160xf32, #tpu.memory_space<vmem>>, vector<1x160xf32>
    %68 = vector.broadcast %67 : vector<1x160xf32> to vector<48x160xf32>
    %69 = arith.addf %66, %68 : vector<48x160xf32>
    %cst_21 = arith.constant 0.000000e+00 : f32
    %70 = vector.broadcast %cst_21 : f32 to vector<48x160xf32>
    %71 = arith.maximumf %69, %70 : vector<48x160xf32>
    %72 = vector.extract_strided_slice %71 {offsets = [0, 0], sizes = [1, 160], strides = [1, 1]} : vector<48x160xf32> to vector<1x160xf32>
    %73 = vector.extract_strided_slice %71 {offsets = [4, 0], sizes = [1, 160], strides = [1, 1]} : vector<48x160xf32> to vector<1x160xf32>
    %74 = vector.extract_strided_slice %71 {offsets = [8, 0], sizes = [1, 160], strides = [1, 1]} : vector<48x160xf32> to vector<1x160xf32>
    %75 = vector.extract_strided_slice %71 {offsets = [12, 0], sizes = [1, 160], strides = [1, 1]} : vector<48x160xf32> to vector<1x160xf32>
    %76 = tpu.concatenate %72, %73, %74, %75 in 1 : vector<1x160xf32>, vector<1x160xf32>, vector<1x160xf32>, vector<1x160xf32> -> vector<1x640xf32>
    %77 = vector.extract_strided_slice %71 {offsets = [24, 0], sizes = [1, 160], strides = [1, 1]} : vector<48x160xf32> to vector<1x160xf32>
    %78 = vector.extract_strided_slice %71 {offsets = [28, 0], sizes = [1, 160], strides = [1, 1]} : vector<48x160xf32> to vector<1x160xf32>
    %79 = vector.extract_strided_slice %71 {offsets = [32, 0], sizes = [1, 160], strides = [1, 1]} : vector<48x160xf32> to vector<1x160xf32>
    %80 = vector.extract_strided_slice %71 {offsets = [36, 0], sizes = [1, 160], strides = [1, 1]} : vector<48x160xf32> to vector<1x160xf32>
    %81 = tpu.concatenate %77, %78, %79, %80 in 1 : vector<1x160xf32>, vector<1x160xf32>, vector<1x160xf32>, vector<1x160xf32> -> vector<1x640xf32>
    %82 = tpu.concatenate %76, %81 in 0 : vector<1x640xf32>, vector<1x640xf32> -> vector<2x640xf32>
    %83 = arith.truncf %82 : vector<2x640xf32> to vector<2x640xbf16>
    %c0_22 = arith.constant 0 : index
    %c0_23 = arith.constant 0 : index
    %84 = vector.load %arg6[%c0_22, %c0_23] : memref<640x64xbf16, #tpu.memory_space<vmem>>, vector<640x64xbf16>
    %cst_24 = arith.constant dense<0.000000e+00> : vector<2x64xf32>
    %85 = tpu.matmul %83, %84, %cst_24 {dimension_numbers = #tpu.dot_dimension_numbers<[1], [0], [0], [1], [0, 0, 1, 1], [], []>} : vector<2x640xbf16>, vector<640x64xbf16>, vector<2x64xf32> -> vector<2x64xf32>
    %c0_25 = arith.constant 0 : index
    %c0_26 = arith.constant 0 : index
    %86 = vector.load %arg7[%c0_25, %c0_26] : memref<1x64xf32, #tpu.memory_space<vmem>>, vector<1x64xf32>
    %87 = vector.broadcast %86 : vector<1x64xf32> to vector<2x64xf32>
    %88 = arith.addf %85, %87 : vector<2x64xf32>
    %cst_27 = arith.constant 0.000000e+00 : f32
    %89 = vector.broadcast %cst_27 : f32 to vector<2x64xf32>
    %90 = arith.maximumf %88, %89 : vector<2x64xf32>
    %91 = arith.truncf %90 : vector<2x64xf32> to vector<2x64xbf16>
    %c0_28 = arith.constant 0 : index
    %c0_29 = arith.constant 0 : index
    %92 = vector.load %arg8[%c0_28, %c0_29] : memref<64x128xbf16, #tpu.memory_space<vmem>>, vector<64x128xbf16>
    %cst_30 = arith.constant dense<0.000000e+00> : vector<2x128xf32>
    %93 = tpu.matmul %91, %92, %cst_30 {dimension_numbers = #tpu.dot_dimension_numbers<[1], [0], [0], [1], [0, 0, 1, 1], [], []>} : vector<2x64xbf16>, vector<64x128xbf16>, vector<2x128xf32> -> vector<2x128xf32>
    %c0_31 = arith.constant 0 : index
    %c0_32 = arith.constant 0 : index
    %94 = vector.load %arg9[%c0_31, %c0_32] : memref<1x128xf32, #tpu.memory_space<vmem>>, vector<1x128xf32>
    %95 = vector.broadcast %94 : vector<1x128xf32> to vector<2x128xf32>
    %96 = arith.addf %93, %95 : vector<2x128xf32>
    %cst_33 = arith.constant dense<0xFF800000> : vector<128xf32>
    %97 = vector.multi_reduction <maximumf>, %96, %cst_33 [0] : vector<2x128xf32> to vector<128xf32>
    %98 = vector.shape_cast %97 : vector<128xf32> to vector<1x128xf32>
    %99 = vector.broadcast %98 : vector<1x128xf32> to vector<2x128xf32>
    %100 = arith.subf %96, %99 : vector<2x128xf32>
    %101 = math.exp %100 : vector<2x128xf32>
    %cst_34 = arith.constant dense<0.000000e+00> : vector<128xf32>
    %102 = vector.multi_reduction <add>, %101, %cst_34 [0] : vector<2x128xf32> to vector<128xf32>
    %103 = vector.shape_cast %102 : vector<128xf32> to vector<1x128xf32>
    %104 = math.log %103 : vector<1x128xf32>
    %105 = arith.addf %104, %98 : vector<1x128xf32>
    %106 = vector.broadcast %105 : vector<1x128xf32> to vector<2x128xf32>
    %107 = arith.subf %96, %106 : vector<2x128xf32>
    %c0_35 = arith.constant 0 : index
    %c0_36 = arith.constant 0 : index
    %108 = vector.load %arg10[%c0_35, %c0_36] : memref<2x128xf32, #tpu.memory_space<vmem>>, vector<2x128xf32>
    tpu.vector_store %arg10[%c0_35, %c0_36], %107 {strides = array<i32>} : memref<2x128xf32, #tpu.memory_space<vmem>>, vector<2x128xf32>,
    return
  }
  func.func @transform_0(%arg0: i32) -> (i32, i32, i32) {
    %c0_i32 = arith.constant 0 : i32
    %c0_i32_0 = arith.constant 0 : i32
    %c0_i32_1 = arith.constant 0 : i32
    %c0_i32_2 = arith.constant 0 : i32
    return %c0_i32, %c0_i32_0, %c0_i32_1 : i32, i32, i32
  }
  func.func @transform_1(%arg0: i32) -> (i32, i32) {
    %c0_i32 = arith.constant 0 : i32
    %c0_i32_0 = arith.constant 0 : i32
    %c0_i32_1 = arith.constant 0 : i32
    return %c0_i32, %c0_i32_0 : i32, i32
  }
  func.func @transform_2(%arg0: i32) -> (i32, i32) {
    %c0_i32 = arith.constant 0 : i32
    %c0_i32_0 = arith.constant 0 : i32
    %c0_i32_1 = arith.constant 0 : i32
    return %c0_i32, %c0_i32_0 : i32, i32
  }
  func.func @transform_3(%arg0: i32) -> (i32, i32) {
    %c0_i32 = arith.constant 0 : i32
    %c0_i32_0 = arith.constant 0 : i32
    %c0_i32_1 = arith.constant 0 : i32
    return %c0_i32, %c0_i32_0 : i32, i32
  }
  func.func @transform_4(%arg0: i32) -> (i32, i32) {
    %c0_i32 = arith.constant 0 : i32
    %c0_i32_0 = arith.constant 0 : i32
    %c0_i32_1 = arith.constant 0 : i32
    return %c0_i32, %c0_i32_0 : i32, i32
  }
  func.func @transform_5(%arg0: i32) -> (i32, i32) {
    %c0_i32 = arith.constant 0 : i32
    %c0_i32_0 = arith.constant 0 : i32
    %c0_i32_1 = arith.constant 0 : i32
    return %c0_i32, %c0_i32_0 : i32, i32
  }
  func.func @transform_6(%arg0: i32) -> (i32, i32) {
    %c0_i32 = arith.constant 0 : i32
    %c0_i32_0 = arith.constant 0 : i32
    %c0_i32_1 = arith.constant 0 : i32
    return %c0_i32, %c0_i32_0 : i32, i32
  }
  func.func @transform_7(%arg0: i32) -> (i32, i32) {
    %c0_i32 = arith.constant 0 : i32
    %c0_i32_0 = arith.constant 0 : i32
    %c0_i32_1 = arith.constant 0 : i32
    return %c0_i32, %c0_i32_0 : i32, i32
  }
  func.func @transform_8(%arg0: i32) -> (i32, i32) {
    %c0_i32 = arith.constant 0 : i32
    %c0_i32_0 = arith.constant 0 : i32
    %c0_i32_1 = arith.constant 0 : i32
    return %c0_i32, %c0_i32_0 : i32, i32
  }
  func.func @transform_9(%arg0: i32) -> (i32, i32) {
    %c0_i32 = arith.constant 0 : i32
    %c0_i32_0 = arith.constant 0 : i32
    %c0_i32_1 = arith.constant 0 : i32
    return %c0_i32, %c0_i32_0 : i32, i32
  }
}

</mosaic_0001>

<bundles_post_ra>
// kernel: net_forward.1
= control target key start
LH: loop header
LB: loop body
LE: loop exit
PB: predicated region body
PF: predicated region fallthrough
CT: control target
= control target key end

     0   :  { %vm47_vm0 = vcmask 1046528   ;;  %vm81_vm1 = vcmask 1044480   ;;  %vm66_vm2 = vcmask 1045504   ;;  %vm96_vm3 = vcmask 1043456   ;;  %s2646_s25 = smov 28   ;;  %s2647_s28 = smov 84   ;;  %s3593_s0 = inlined_call_operand.vmem [shape: f32[2,28,28], index: 0, kind: input, shape index: {}]   ;;  %s3594_s1 = inlined_call_operand.vmem [shape: bf16[140,256], index: 1, kind: input, shape index: {}]   ;;  %s3595_s2 = inlined_call_operand.vmem [shape: f32[1,128], index: 2, kind: input, shape index: {}]   ;;  %s3596_s3 = inlined_call_operand.vmem [shape: bf16[128,800], index: 3, kind: input, shape index: {}]   ;;  %s3597_s4 = inlined_call_operand.vmem [shape: f32[1,160], index: 4, kind: input, shape index: {}]   ;;  %s3598_s5 = inlined_call_operand.vmem [shape: bf16[640,64], index: 5, kind: input, shape index: {}]   ;;  %s3599_s6 = inlined_call_operand.vmem [shape: f32[1,64], index: 6, kind: input, shape index: {}]   ;;  %s3600_s7 = inlined_call_operand.vmem [shape: bf16[64,128], index: 7, kind: input, shape index: {}]   ;;  %s3601_s8 = inlined_call_operand.vmem [shape: f32[1,128], index: 8, kind: input, shape index: {}]   ;;  %s3602_s9 = inlined_call_operand.hbm [shape: f32[2,128], index: 9, kind: output, shape index: {}]  }
   0x1   :  { %v2711_v0 = vld [vmem:[%s3593_s0] sm:$0xff]  ;;  %v2716_v1 = vld [vmem:[%s3593_s0 + $0x8] sm:$0xff]  ;;  %v2721_v2 = vld [vmem:[%s3593_s0 + $0x10] sm:$0xff]  ;;  %s2648_s15 = smov 56   ;;  %s2649_s16 = smov 112  }
   0x2   :  { %v48_v3 = vrot.slane %v2711_v0, 1  ;;  %v49_v4 = vrot.slane %v2716_v1, 1  ;;  %v51_v5 = vrot.slane %v2721_v2, 1  ;;  %v82_v6 = vrot.slane %v2711_v0, 3  ;;  %v37_v14 = vld [vmem:[%s3593_s0 + $0x18] sm:$0xf] }
   0x3   :  { %v83_v7 = vrot.slane %v2716_v1, 3  ;;  %v85_v8 = vrot.slane %v2721_v2, 3  ;;  %v67_v9 = vrot.slane %v2711_v0, 2  ;;  %v68_v12 = vrot.slane %v2716_v1, 2  ;;  %v2740_v15 = vld [vmem:[%s3593_s0 + $0x20] sm:$0xff]  ;;  %v2747_v19 = vld [vmem:[%s3593_s0 + $0x28] sm:$0xff] }
   0x4   :  { %v50_v10 = vsel %vm47_vm0, %v48_v3, %v49_v4  ;;  %v52_v11 = vsel %vm47_vm0, %v49_v4, %v51_v5  ;;  %v70_v13 = vrot.slane %v2721_v2, 2  ;;  %v97_v23 = vrot.slane %v2711_v0, 4  ;;  %v2467_v24 = vld [vmem:[%s3594_s1 + $0x4] ss:$8 sps:$4 sm:$0xff]   ;;  %v2469_v25 = vld [vmem:[%s3594_s1] ss:$8 sps:$4 sm:$0xff]  }
   0x5   :  { %v2392_v16 = vpack.i.bf16 %v52_v11, %v50_v10  ;;  %v84_v17 = vsel %vm81_vm1, %v82_v6, %v83_v7  ;;  %v86_v18 = vsel %vm81_vm1, %v83_v7, %v85_v8  ;;  %v69_v21 = vsel %vm66_vm2, %v67_v9, %v68_v12  ;;  %v2470_v30 = vld [vmem:[%s3594_s1 + $0x14] ss:$8 sps:$4 sm:$0xff]   ;;  %v2776_v36 = vld [vmem:[%s3593_s0 + $0x38] sm:$0xf]  ;;  %339 = vmatprep.subr.bf16.mxu0 %v2467_v24  ;;  %v2473_v46 = vld [vmem:[%s3594_s1 + $0x24] ss:$8 sps:$4 sm:$0xff]  }
   0x6   :  { %v2402_v20 = vpack.i.bf16 %v86_v18, %v84_v17  ;;  %v71_v22 = vsel %vm66_vm2, %v68_v12, %v70_v13  ;;  %v98_v27 = vrot.slane %v2716_v1, 4  ;;  %v100_v28 = vrot.slane %v2721_v2, 4  ;;  %v2771_v35 = vld [vmem:[%s3593_s0 + $0x30] sm:$0xff]  ;;  %340 = vmatpush1.bf16.msra.mxu0 %v2469_v25  ;;  %v2475_v59 = vld [vmem:[%s3594_s1 + $0x20] ss:$8 sps:$4 sm:$0xff]  }
   0x7   :  { %2393 = vrot.lane.b32.xlu0 %v2392_v16, %s2646_s25  ;;  %v2397_v26 = vpack.i.bf16 %v71_v22, %v69_v21  ;;  %v53_v29 = vrot.slane %v37_v14, 1  ;;  %v59_v31 = vrot.slane %v2740_v15, 1  ;;  %v60_v32 = vrot.slane %v2747_v19, 1  ;;  %v2472_v41 = vld [vmem:[%s3594_s1 + $0x10] ss:$8 sps:$4 sm:$0xff]   ;;  %341 = vmatprep.subr.bf16.mxu0 %v2470_v30 }
   0x8   :  { %2403 = vrot.lane.b32.xlu1 %v2402_v20, %s2647_s28  ;;  %v72_v33 = vrot.slane %v37_v14, 2  ;;  %v74_v34 = vrot.slane %v2740_v15, 2  ;;  %v99_v37 = vsel %vm96_vm3, %v97_v23, %v98_v27  ;;  %v101_v38 = vsel %vm96_vm3, %v98_v27, %v100_v28  ;;  %v2476_v63 = vld [vmem:[%s3594_s1 + $0x34] ss:$8 sps:$4 sm:$0xff]   ;;  %v2479_v16 = vld [vmem:[%s3594_s1 + $0x44] ss:$8 sps:$4 sm:$0xff]  }
   0x9   :  { %v54_v39 = vsel %vm47_vm0, %v51_v5, %v53_v29  ;;  %v75_v40 = vrot.slane %v2747_v19, 2  ;;  %v2407_v42 = vpack.i.bf16 %v101_v38, %v99_v37  ;;  %v61_v43 = vsel %vm47_vm0, %v59_v31, %v60_v32  ;;  %v2481_v24 = vld [vmem:[%s3594_s1 + $0x40] ss:$8 sps:$4 sm:$0xff]   ;;  %v2482_v27 = vld [vmem:[%s3594_s1 + $0x54] ss:$8 sps:$4 sm:$0xff]  }
   0xa   :  { %v73_v44 = vsel %vm66_vm2, %v70_v13, %v72_v33  ;;  %v87_v45 = vrot.slane %v37_v14, 3  ;;  %v2412_v47 = vpack.i.bf16 %v61_v43, %v54_v39  ;;  %v89_v49 = vrot.slane %v2740_v15, 3  ;;  %342 = vmatpush1.bf16.msra.mxu0 %v2472_v41  ;;  %v2478_v13 = vld [vmem:[%s3594_s1 + $0x30] ss:$8 sps:$4 sm:$0xff]   ;;  %v2494_v25 = vld [vmem:[%s3596_s3 + $0x4] ss:$28 sps:$4 sm:$0xff]  }
   0xb   :  { %2398 = vrot.lane.b32.xlu0 %v2397_v26, %s2648_s15  ;;  %v76_v48 = vsel %vm66_vm2, %v74_v34, %v75_v40  ;;  %v90_v50 = vrot.slane %v2747_v19, 3  ;;  %v102_v53 = vrot.slane %v37_v14, 4  ;;  %v104_v54 = vrot.slane %v2740_v15, 4  ;;  %343 = vmatprep.subr.bf16.mxu0 %v2473_v46  ;;  %v2496_v26 = vld [vmem:[%s3596_s3] ss:$28 sps:$4 sm:$0xff]  }
   0xc   :  { %2408 = vrot.lane.b32.xlu1 %v2407_v42, %s2649_s16  ;;  %v2417_v51 = vpack.i.bf16 %v76_v48, %v73_v44  ;;  %v88_v52 = vsel %vm81_vm1, %v85_v8, %v87_v45  ;;  %v105_v56 = vrot.slane %v2747_v19, 4  ;;  %v62_v57 = vrot.slane %v2771_v35, 1  ;;  %812 = vmatprep.subr.bf16.mxu1 %v2494_v25  ;;  %v2500_v29 = vld [vmem:[%s3596_s3 + $0x3c] ss:$28 sps:$4 sm:$0xff]   ;;  %v2485_v33 = vld [vmem:[%s3594_s1 + $0x64] ss:$8 sps:$4 sm:$0xff]  }
   0xd   :  { %v91_v55 = vsel %vm81_vm1, %v89_v49, %v90_v50  ;;  %v64_v58 = vrot.slane %v2776_v36, 1  ;;  %v103_v60 = vsel %vm96_vm3, %v100_v28, %v102_v53  ;;  %v77_v61 = vrot.slane %v2771_v35, 2  ;;  %813 = vmatpush1.bf16.msra.mxu1 %v2496_v26  ;;  %v2502_v31 = vld [vmem:[%s3596_s3 + $0x38] ss:$28 sps:$4 sm:$0xff]   ;;  %v2508_v38 = vld [vmem:[%s3596_s3 + $0x70] ss:$28 sps:$4 sm:$0xff]  }
   0xe   :  { %v79_v62 = vrot.slane %v2776_v36, 2  ;;  %v2422_v3 = vpack.i.bf16 %v91_v55, %v88_v52  ;;  %v106_v4 = vsel %vm96_vm3, %v104_v54, %v105_v56  ;;  %v63_v6 = vsel %vm47_vm0, %v60_v32, %v62_v57  ;;  %344 = vmatpush1.bf16.msra.mxu0 %v2475_v59  ;;  %v2484_v32 = vld [vmem:[%s3594_s1 + $0x50] ss:$8 sps:$4 sm:$0xff]   ;;  %814 = vmatprep.subr.bf16.mxu1 %v2500_v29  ;;  %v2488_v37 = vld [vmem:[%s3594_s1 + $0x74] ss:$8 sps:$4 sm:$0xff]  }
   0xf   :  { %2413 = vrot.lane.b32.xlu0 %v2412_v47, %s2646_s25  ;;  %v2427_v5 = vpack.i.bf16 %v106_v4, %v103_v60  ;;  %v65_v7 = vsel %vm47_vm0, %v62_v57, %v64_v58  ;;  %v92_v8 = vrot.slane %v2771_v35, 3  ;;  %v78_v9 = vsel %vm66_vm2, %v75_v40, %v77_v61  ;;  %345 = vmatprep.subr.bf16.mxu0 %v2476_v63  ;;  %v2506_v34 = vld [vmem:[%s3596_s3 + $0x74] ss:$28 sps:$4 sm:$0xff]   ;;  %v2491_v40 = vld [vmem:[%s3594_s1 + $0x84] ss:$8 sps:$4 sm:$0x3f]  }
  0x10   :  { %2418 = vrot.lane.b32.xlu1 %v2417_v51, %s2648_s15  ;;  %v80_v10 = vsel %vm66_vm2, %v77_v61, %v79_v62  ;;  %v94_v11 = vrot.slane %v2776_v36, 3  ;;  %v107_v12 = vrot.slane %v2771_v35, 4  ;;  %v109_v14 = vrot.slane %v2776_v36, 4  ;;  %v2487_v36 = vld [vmem:[%s3594_s1 + $0x60] ss:$8 sps:$4 sm:$0xff]  }
  0x11   :  { %v2432_v17 = vpack.i.bf16 %v65_v7, %v63_v6  ;;  %v2437_v18 = vpack.i.bf16 %v80_v10, %v78_v9  ;;  %v93_v20 = vsel %vm81_vm1, %v90_v50, %v92_v8  ;;  %815 = vmatpush1.bf16.msra.mxu1 %v2502_v31  ;;  %v2490_v39 = vld [vmem:[%s3594_s1 + $0x70] ss:$8 sps:$4 sm:$0xff]   ;;  %v2493_v41 = vld [vmem:[%s3594_s1 + $0x80] ss:$8 sps:$4 sm:$0x3f]  }
  0x12   :  { %v95_v21 = vsel %vm81_vm1, %v92_v8, %v94_v11  ;;  %v108_v22 = vsel %vm96_vm3, %v105_v56, %v107_v12  ;;  %v110_v23 = vsel %vm96_vm3, %v107_v12, %v109_v14  ;;  %346 = vmatpush1.bf16.msra.mxu0 %v2478_v13  ;;  %816 = vmatprep.subr.bf16.mxu1 %v2506_v34  ;;  %v2499_v42 = vld [vmem:[%s3596_s3 + $0x14] ss:$28 sps:$4 sm:$0xff]   ;;  %v334_v43 = vsel %vm66_vm2, %v2493_v41, 0 }
  0x13   :  { %2423 = vrot.lane.b32.xlu0 %v2422_v3, %s2647_s28  ;;  %347 = vmatprep.subr.bf16.mxu0 %v2479_v16  ;;  %v2442_v28 = vpack.i.bf16 %v95_v21, %v93_v20  ;;  %v2447_v30 = vpack.i.bf16 %v110_v23, %v108_v22 }
  0x14   :  { %2428 = vrot.lane.b32.xlu1 %v2427_v5, %s2649_s16 }
  0x15   :  { %817 = vmatpush1.bf16.msra.mxu1 %v2508_v38 }
  0x16   :  { %348 = vmatpush1.bf16.msra.mxu0 %v2481_v24 }
  0x17   :  { %2433 = vrot.lane.b32.xlu0 %v2432_v17, %s2646_s25  ;;  %349 = vmatprep.subr.bf16.mxu0 %v2482_v27 }
  0x18   :  { %2438 = vrot.lane.b32.xlu1 %v2437_v18, %s2648_s15 }
  0x1a   :  { %350 = vmatpush1.bf16.msra.mxu0 %v2484_v32 }
  0x1b   :  { %2443 = vrot.lane.b32.xlu0 %v2442_v28, %s2647_s28  ;;  %351 = vmatprep.subr.bf16.mxu0 %v2485_v33 }
  0x1c   :  { %2448 = vrot.lane.b32.xlu1 %v2447_v30, %s2649_s16 }
  0x1e   :  { %352 = vmatpush1.bf16.msra.mxu0 %v2487_v36 }
  0x1f   :  { %353 = vmatprep.subr.bf16.mxu0 %v2488_v37 }
  0x22   :  { %354 = vmatpush1.bf16.msra.mxu0 %v2490_v39 }
  0x23   :  { %2143 = vmatprep.subr.msk.bf16.mxu0 %vm66_vm2, %v2491_v40 }
  0x26   :  { %356 = vmatpush1.bf16.msra.mxu0 %v334_v43 }
  0x27   :  { %938 = vmatprep.subr.bf16.mxu0 %v2499_v42 }
  0x28   :  { %14 = vsyncpa [#allocation3], 0  ;;  %vm183_vm4 = vcmask 228352   ;;  %vm190_vm5 = vcmask 457728   ;;  %vm197_vm6 = vcmask 687104   ;;  %vm204_vm7 = vcmask 916480  }
  0x29   :  { %vm323_vm8 = vcmask 97280   ;;  %v2497_v6 = vld [vmem:[%s3596_s3 + $0x10] ss:$28 sps:$4 sm:$0xff]   ;;  %v2503_v21 = vld [vmem:[%s3596_s3 + $0x48] ss:$28 sps:$4 sm:$0xff]   ;;  %vm2652_vm9 = vmmov 0  }
  0x2a   :  { %v2505_v10 = vld [vmem:[%s3596_s3 + $0x4c] ss:$28 sps:$4 sm:$0xff]   ;;  %v2509_v33 = vld [vmem:[%s3596_s3 + $0x80] ss:$28 sps:$4 sm:$0xff]   ;;  %vm1246_vm10 = vcmask 1041408   ;;  %s2654_s21 = smov 96  }
  0x2b   :  { %s2655_s22 = smov 64   ;;  %vm1120_vm11 = vcmask 785408   ;;  %vm1209_vm12 = vcmask 523264   ;;  %vm1299_vm13 = vcmask 261120   ;;  %s2656_s23 = smov 108   ;;  %vm1414_vm14 = vcmask 883712  }
  0x2c   :  { %vm1543_vm15 = vcmask 1040384  }
  0x79   :  { %v2394_v44 = vpop.permute.xlu0 %2393 }
  0x7a   :  { %v2404_v45 = vpop.permute.xlu1 %2403  ;;  %v2396_v46 = vunpack.i.h.bf16 %v2394_v44  ;;  %v2395_v47 = vunpack.i.l.bf16 %v2394_v44 }
  0x7b   :  { %v2406_v49 = vunpack.i.h.bf16 %v2404_v45  ;;  %v2405_v50 = vunpack.i.l.bf16 %v2404_v45 }
  0x7c   :  { %v185_v54 = vsel %vm183_vm4, %v2716_v1, %v2396_v46  ;;  %v184_v55 = vsel %vm183_vm4, %v2711_v0, %v2395_v47 }
  0x7d   :  { %v2399_v48 = vpop.permute.xlu0 %2398 }
  0x7e   :  { %v2401_v51 = vunpack.i.h.bf16 %v2399_v48  ;;  %v2400_v52 = vunpack.i.l.bf16 %v2399_v48  ;;  %v2409_v53 = vpop.permute.xlu1 %2408 }
  0x7f   :  { %v2411_v56 = vunpack.i.h.bf16 %v2409_v53  ;;  %v2410_v57 = vunpack.i.l.bf16 %v2409_v53  ;;  %v2517_v53 = vld [vmem:[%s3596_s3 + $0xbc] ss:$28 sps:$4 sm:$0xff]  }
  0x80   :  { %v191_v58 = vsel %vm190_vm5, %v184_v55, %v2400_v52  ;;  %v192_v59 = vsel %vm190_vm5, %v185_v54, %v2401_v51  ;;  %v2512_v51 = vld [vmem:[%s3596_s3 + $0xac] ss:$28 sps:$4 sm:$0xff]   ;;  %v2515_v54 = vld [vmem:[%s3596_s3 + $0xb8] ss:$28 sps:$4 sm:$0xff]   ;;  %v2518_v55 = vld [vmem:[%s3596_s3 + $0xe4] ss:$28 sps:$4 sm:$0xff]  }
  0x81   :  { %v2414_v60 = vpop.permute.xlu0 %2413  ;;  %v212_v61 = vpack.c.bf16 %v2411_v56, %v2410_v57  ;;  %v198_v62 = vsel %vm197_vm6, %v191_v58, %v2405_v50  ;;  %v199_v63 = vsel %vm197_vm6, %v192_v59, %v2406_v49  ;;  %v2514_v52 = vld [vmem:[%s3596_s3 + $0xa8] ss:$28 sps:$4 sm:$0xff]   ;;  %818 = vmatprep.subr.bf16.mxu1 %v2512_v51  ;;  %v2521_v58 = vld [vmem:[%s3596_s3 + $0xf0] ss:$28 sps:$4 sm:$0xff]   ;;  %v2524_v59 = vld [vmem:[%s3596_s3 + $0x11c] ss:$28 sps:$4 sm:$0xff]  }
  0x82   :  { %v2416_v3 = vunpack.i.h.bf16 %v2414_v60  ;;  %v2415_v4 = vunpack.i.l.bf16 %v2414_v60  ;;  %v2419_v5 = vpop.permute.xlu1 %2418  ;;  %v205_v1 = vsel %vm204_vm7, %v198_v62, %v2410_v57  ;;  %v206_v0 = vsel %vm204_vm7, %v199_v63, %v2411_v56  ;;  %819 = vmatpush1.bf16.msra.mxu1 %v2514_v52  ;;  %v2520_v56 = vld [vmem:[%s3596_s3 + $0xe0] ss:$28 sps:$4 sm:$0xff]   ;;  %v2523_v57 = vld [vmem:[%s3596_s3 + $0xf4] ss:$28 sps:$4 sm:$0xff]   ;;  %v2527_v62 = vld [vmem:[%s3596_s3 + $0x128] ss:$28 sps:$4 sm:$0xff]  }
  0x83   :  { %v2421_v7 = vunpack.i.h.bf16 %v2419_v5  ;;  %v2420_v8 = vunpack.i.l.bf16 %v2419_v5  ;;  %2144 = vmatprep.mubr.msk.bf16.mxu0 %vm323_vm8, %v212_v61  ;;  %v211_v9 = vpack.c.bf16 %v206_v0, %v205_v1  ;;  %820 = vmatprep.subr.bf16.mxu1 %v2518_v55  ;;  %v2526_v60 = vld [vmem:[%s3596_s3 + $0x118] ss:$28 sps:$4 sm:$0xff]   ;;  %v2529_v61 = vld [vmem:[%s3596_s3 + $0x12c] ss:$28 sps:$4 sm:$0xff]   ;;  %v2533_v5 = vld [vmem:[%s3596_s3 + $0x160] ss:$28 sps:$4 sm:$0xff]  }
  0x84   :  { %v187_v11 = vsel %vm183_vm4, %v2740_v15, %v2416_v3  ;;  %v186_v12 = vsel %vm183_vm4, %v2721_v2, %v2415_v4  ;;  %v2511_v2 = vld [vmem:[%s3596_s3 + $0x84] ss:$28 sps:$4 sm:$0xff]   ;;  %v2530_v63 = vld [vmem:[%s3596_s3 + $0x154] ss:$28 sps:$4 sm:$0xff]   ;;  %v2536_v1 = vld [vmem:[%s3596_s3 + $0x18c] ss:$28 sps:$4 sm:$0xff]  }
  0x85   :  { %v193_v13 = vsel %vm190_vm5, %v186_v12, %v2420_v8  ;;  %v194_v14 = vsel %vm190_vm5, %v187_v11, %v2421_v7  ;;  %v2424_v16 = vpop.permute.xlu0 %2423  ;;  %372 = vmatmul.mubr.bf16.vlgmr.msra.gmra.mrb[0].mxu0 %v211_v9  ;;  %v2532_v3 = vld [vmem:[%s3596_s3 + $0x150] ss:$28 sps:$4 sm:$0xff]   ;;  %v2535_v4 = vld [vmem:[%s3596_s3 + $0x164] ss:$28 sps:$4 sm:$0xff]   ;;  %v2539_v7 = vld [vmem:[%s3596_s3 + $0x198] ss:$28 sps:$4 sm:$0xff]  }
  0x86   :  { %v2426_v17 = vunpack.i.h.bf16 %v2424_v16  ;;  %v2425_v18 = vunpack.i.l.bf16 %v2424_v16  ;;  %v2429_v20 = vpop.permute.xlu1 %2428  ;;  %939 = vmatpush1.bf16.msra.mxu0 %v2497_v6  ;;  %821 = vmatpush1.bf16.msra.mxu1 %v2520_v56  ;;  %v2538_v0 = vld [vmem:[%s3596_s3 + $0x188] ss:$28 sps:$4 sm:$0xff]   ;;  %v2541_v6 = vld [vmem:[%s3596_s3 + $0x19c] ss:$28 sps:$4 sm:$0xff]   ;;  %v2650_v9 = vmov 0  }
  0x87   :  { %v2431_v22 = vunpack.i.h.bf16 %v2429_v20  ;;  %v2430_v23 = vunpack.i.l.bf16 %v2429_v20  ;;  %940 = vmatprep.subr.bf16.mxu0 %v2505_v10  ;;  %822 = vmatprep.subr.bf16.mxu1 %v2524_v59  ;;  %v2544_v8 = vld [vmem:[%s3596_s3 + $0xc] ss:$28 sps:$4 sm:$0xff]   ;;  %v2545_v52 = vld [vmem:[%s3596_s3 + $0x40] ss:$28 sps:$4 sm:$0xff]  }
  0x88   :  { %v200_v15 = vsel %vm197_vm6, %v193_v13, %v2425_v18  ;;  %v201_v24 = vsel %vm197_vm6, %v194_v14, %v2426_v17  ;;  %844 = vmatprep.mubr.bf16.mxu1 %v2650_v9  ;;  %v2550_v55 = vld [vmem:[%s3596_s3 + $0x7c] ss:$28 sps:$4 sm:$0xff]  }
  0x89   :  { %v214_v25 = vpack.c.bf16 %v2431_v22, %v2430_v23  ;;  %v2434_v26 = vpop.permute.xlu0 %2433  ;;  %v207_v27 = vsel %vm204_vm7, %v200_v15, %v2430_v23  ;;  %v208_v28 = vsel %vm204_vm7, %v201_v24, %v2431_v22 }
  0x8a   :  { %v2436_v29 = vunpack.i.h.bf16 %v2434_v26  ;;  %v2435_v30 = vunpack.i.l.bf16 %v2434_v26  ;;  %v2439_v31 = vpop.permute.xlu1 %2438  ;;  %v213_v32 = vpack.c.bf16 %v208_v28, %v207_v27  ;;  %941 = vmatpush1.bf16.msra.mxu0 %v2503_v21  ;;  %823 = vmatpush1.bf16.msra.mxu1 %v2526_v60  ;;  %v2147_v27 = vld [vmem:[%s3595_s2] ss:$0 sm:$0xff] }
  0x8b   :  { %v2441_v34 = vunpack.i.h.bf16 %v2439_v31  ;;  %v2440_v36 = vunpack.i.l.bf16 %v2439_v31  ;;  %2145 = vmatprep.mubr.msk.bf16.mxu0 %vm323_vm8, %v214_v25  ;;  %942 = vmatprep.subr.bf16.mxu0 %v2511_v2 }
  0x8c   :  { %v189_v37 = vsel %vm183_vm4, %v2771_v35, %v2436_v29  ;;  %v188_v38 = vsel %vm183_vm4, %v2747_v19, %v2435_v30  ;;  %824 = vmatprep.subr.bf16.mxu1 %v2530_v63 }
  0x8d   :  { %v195_v39 = vsel %vm190_vm5, %v188_v38, %v2440_v36  ;;  %v196_v40 = vsel %vm190_vm5, %v189_v37, %v2441_v34  ;;  %382 = vmatmul.mubr.bf16.gmra.mrb[4].mxu0 %v213_v32  ;;  %v2444_v41 = vpop.permute.xlu0 %2443 }
  0x8e   :  { %v2446_v42 = vunpack.i.h.bf16 %v2444_v41  ;;  %v2445_v43 = vunpack.i.l.bf16 %v2444_v41  ;;  %v2449_v44 = vpop.permute.xlu1 %2448  ;;  %943 = vmatpush1.bf16.msra.mxu0 %v2509_v33  ;;  %825 = vmatpush1.bf16.msra.mxu1 %v2532_v3 }
  0x8f   :  { %v2451_v45 = vunpack.i.h.bf16 %v2449_v44  ;;  %v2450_v46 = vunpack.i.l.bf16 %v2449_v44  ;;  %944 = vmatprep.subr.bf16.mxu0 %v2517_v53  ;;  %826 = vmatprep.subr.bf16.mxu1 %v2536_v1  ;;  %v2551_v1 = vld [vmem:[%s3596_s3 + $0xb0] ss:$28 sps:$4 sm:$0xff]  }
  0x90   :  { %v202_v47 = vsel %vm197_vm6, %v195_v39, %v2445_v43  ;;  %v203_v48 = vsel %vm197_vm6, %v196_v40, %v2446_v42 }
  0x91   :  { %v216_v35 = vpack.c.bf16 %v2451_v45, %v2450_v46  ;;  %v209_v49 = vsel %vm204_vm7, %v202_v47, %v2450_v46  ;;  %v210_v19 = vsel %vm204_vm7, %v203_v48, %v2451_v45  ;;  %v2542_v45 = vld [vmem:[%s3596_s3 + $0x8] ss:$28 sps:$4 sm:$0xff]  }
  0x92   :  { %v215_v50 = vpack.c.bf16 %v210_v19, %v209_v49  ;;  %945 = vmatpush1.bf16.msra.mxu0 %v2515_v54  ;;  %827 = vmatpush1.bf16.msra.mxu1 %v2538_v0  ;;  %v2547_v47 = vld [vmem:[%s3596_s3 + $0x44] ss:$28 sps:$4 sm:$0xff]   ;;  %v2556_v0 = vld [vmem:[%s3596_s3 + $0xec] ss:$28 sps:$4 sm:$0xff]  }
  0x93   :  { %2146 = vmatprep.mubr.msk.bf16.mxu0 %vm323_vm8, %v216_v35  ;;  %946 = vmatprep.subr.bf16.mxu0 %v2523_v57 }
  0x94   :  { %875 = vmatprep.subr.bf16.mxu1 %v2544_v8  ;;  %v2557_v8 = vld [vmem:[%s3596_s3 + $0x120] ss:$28 sps:$4 sm:$0xff]  }
  0x95   :  { %392 = vmatmul.mubr.bf16.gmra.mrb[8].mxu0 %v215_v50 }
  0x96   :  { %947 = vmatpush1.bf16.msra.mxu0 %v2521_v58  ;;  %970 = vmatprep.mubr.bf16.mxu0 %v2650_v9 }
  0x97   :  { %948 = vmatprep.subr.bf16.mxu0 %v2529_v61  ;;  %v2548_v61 = vld [vmem:[%s3596_s3 + $0x78] ss:$28 sps:$4 sm:$0xff]  }
  0x9a   :  { %949 = vmatpush1.bf16.msra.mxu0 %v2527_v62 }
  0x9b   :  { %950 = vmatprep.subr.bf16.mxu0 %v2535_v4  ;;  %v2553_v4 = vld [vmem:[%s3596_s3 + $0xb4] ss:$28 sps:$4 sm:$0xff]  }
  0x9e   :  { %951 = vmatpush1.bf16.msra.mxu0 %v2533_v5 }
  0x9f   :  { %952 = vmatprep.subr.bf16.mxu0 %v2541_v6  ;;  %v2554_v6 = vld [vmem:[%s3596_s3 + $0xe8] ss:$28 sps:$4 sm:$0xff]  }
  0xa2   :  { %953 = vmatpush1.bf16.msra.mxu0 %v2539_v7  ;;  %v2559_v7 = vld [vmem:[%s3596_s3 + $0x124] ss:$28 sps:$4 sm:$0xff]  }
 0x158   :  { %v373_v10 = vpop.f32.mrb[0].mxu0 }
 0x159   :  { %v375_v11 = vpop.f32.mrb[1].mxu0 }
 0x15a   :  { %v402_v12 = vmax.f32 %v373_v10, %v375_v11  ;;  %v377_v13 = vpop.f32.mrb[2].mxu0  ;;  %v2562_v10 = vld [vmem:[%s3596_s3 + $0x15c] ss:$28 sps:$4 sm:$0xff]  }
 0x15b   :  { %v379_v14 = vpop.f32.mrb[3].mxu0  ;;  %v2560_v11 = vld [vmem:[%s3596_s3 + $0x158] ss:$28 sps:$4 sm:$0xff]  }
 0x15c   :  { %v403_v16 = vmax.f32 %v377_v13, %v379_v14  ;;  %v414_v17 = vrot.slane %v402_v12, 1  ;;  %v2563_v13 = vld [vmem:[%s3596_s3 + $0x190] ss:$28 sps:$4 sm:$0xff]   ;;  %v2566_v14 = vld [vmem:[%s3596_s3 + $0x18] ss:$28 sps:$4 sm:$0xff]  }
 0x15e   :  { %v415_v18 = vrot.slane %v403_v16, 1 }
 0x160   :  { %v416_v20 = vsel %vm47_vm0, %v414_v17, %v415_v18  ;;  %v383_v21 = vpop.f32.mrb[4].mxu0  ;;  %v2567_v17 = vld [vmem:[%s3596_s3 + $0x50] ss:$28 sps:$4 sm:$0xff]  }
 0x161   :  { %v432_v22 = vmax.f32 %v402_v12, %v416_v20  ;;  %v385_v23 = vpop.f32.mrb[5].mxu0  ;;  %v2565_v12 = vld [vmem:[%s3596_s3 + $0x194] ss:$28 sps:$4 sm:$0xff]   ;;  %v2569_v20 = vld [vmem:[%s3596_s3 + $0xc0] ss:$28 sps:$4 sm:$0xff]  }
 0x162   :  { %v404_v2 = vmax.f32 %v383_v21, %v385_v23  ;;  %v387_v15 = vpop.f32.mrb[6].mxu0  ;;  %v2570_v21 = vld [vmem:[%s3596_s3 + $0xf8] ss:$28 sps:$4 sm:$0xff]   ;;  %v2573_v23 = vld [vmem:[%s3596_s3 + $0x1a0] ss:$28 sps:$4 sm:$0xff]  }
 0x163   :  { %v389_v24 = vpop.f32.mrb[7].mxu0  ;;  %v445_v31 = vadd.f32 %v2147_v27, %v432_v22  ;;  %v2571_v22 = vld [vmem:[%s3596_s3 + $0x130] ss:$28 sps:$4 sm:$0xff]  }
 0x164   :  { %v417_v25 = vrot.slane %v404_v2, 1  ;;  %v405_v26 = vmax.f32 %v387_v15, %v389_v24 }
 0x165   :  { %v451_v41 = vmax.f32 %v445_v31, 0.0 }
 0x166   :  { %v418_v28 = vsel %vm47_vm0, %v415_v18, %v417_v25  ;;  %v419_v29 = vrot.slane %v405_v26, 1  ;;  %v2568_v18 = vld [vmem:[%s3596_s3 + $0x88] ss:$28 sps:$4 sm:$0xff]  }
 0x167   :  { %v433_v30 = vmax.f32 %v403_v16, %v418_v28  ;;  %v2651_v16 = vmov 0.0  }
 0x168   :  { %v420_v32 = vsel %vm47_vm0, %v417_v25, %v419_v29  ;;  %v393_v33 = vpop.f32.mrb[8].mxu0 }
 0x169   :  { %v434_v34 = vmax.f32 %v404_v2, %v420_v32  ;;  %v395_v36 = vpop.f32.mrb[9].mxu0  ;;  %v446_v37 = vadd.f32 %v2147_v27, %v433_v30 }
 0x16a   :  { %v406_v38 = vmax.f32 %v393_v33, %v395_v36  ;;  %v397_v39 = vpop.f32.mrb[10].mxu0 }
 0x16b   :  { %v399_v40 = vpop.f32.mrb[11].mxu0  ;;  %v452_v42 = vmax.f32 %v446_v37, 0.0  ;;  %v447_v19 = vadd.f32 %v2147_v27, %v434_v34 }
 0x16c   :  { %v421_v43 = vrot.slane %v406_v38, 1  ;;  %v407_v44 = vmax.f32 %v397_v39, %v399_v40 }
 0x16d   :  { %v3009_v46 = vpack.c.bf16 %v452_v42, %v451_v41  ;;  %v453_v59 = vmax.f32 %v447_v19, 0.0 }
 0x16e   :  { %v422_v48 = vsel %vm47_vm0, %v419_v29, %v421_v43  ;;  %v423_v35 = vrot.slane %v407_v44, 1 }
 0x16f   :  { %v435_v49 = vmax.f32 %v405_v26, %v422_v48  ;;  %845 = vmatmul.mubr.bf16.vlgmr.msra.gmra.mrb[0].mxu1 %v3009_v46  ;;  %971 = vmatmul.mubr.bf16.vlgmr.msra.gmra.mrb[12].mxu0 %v3009_v46 }
 0x170   :  { %v424_v50 = vsel %vm47_vm0, %v421_v43, %v423_v35  ;;  %v431_v51 = vsel %vm47_vm0, %v423_v35, 0.0  ;;  %876 = vmatpush1.bf16.msra.mxu1 %v2542_v45  ;;  %854 = vmatprep.mubr.bf16.mxu1 %v2650_v9 }
 0x171   :  { %v436_v53 = vmax.f32 %v406_v38, %v424_v50  ;;  %v437_v54 = vmax.f32 %v407_v44, %v431_v51  ;;  %877 = vmatprep.subr.bf16.mxu1 %v2547_v47  ;;  %979 = vmatprep.mubr.bf16.mxu0 %v2650_v9  ;;  %v448_v56 = vadd.f32 %v2147_v27, %v435_v49 }
 0x173   :  { %v449_v57 = vadd.f32 %v2147_v27, %v436_v53  ;;  %v450_v58 = vadd.f32 %v2147_v27, %v437_v54  ;;  %v454_v60 = vmax.f32 %v448_v56, 0.0 }
 0x174   :  { %878 = vmatpush1.bf16.msra.mxu1 %v2545_v52 }
 0x175   :  { %v455_v62 = vmax.f32 %v449_v57, 0.0  ;;  %v456_v63 = vmax.f32 %v450_v58, 0.0  ;;  %879 = vmatprep.subr.bf16.mxu1 %v2550_v55  ;;  %v3030_v3 = vpack.c.bf16 %v454_v60, %v453_v59 }
 0x177   :  { %v3035_v5 = vpack.c.bf16 %v456_v63, %v455_v62  ;;  %855 = vmatmul.mubr.bf16.gmra.mrb[4].mxu1 %v3030_v3  ;;  %980 = vmatmul.mubr.bf16.gmra.mrb[16].mxu0 %v3030_v3 }
 0x178   :  { %880 = vmatpush1.bf16.msra.mxu1 %v2548_v61  ;;  %864 = vmatprep.mubr.bf16.mxu1 %v2650_v9 }
 0x179   :  { %881 = vmatprep.subr.bf16.mxu1 %v2553_v4  ;;  %989 = vmatprep.mubr.bf16.mxu0 %v2650_v9 }
 0x17c   :  { %882 = vmatpush1.bf16.msra.mxu1 %v2551_v1 }
 0x17d   :  { %883 = vmatprep.subr.bf16.mxu1 %v2556_v0 }
 0x17f   :  { %865 = vmatmul.mubr.bf16.gmra.mrb[8].mxu1 %v3035_v5  ;;  %990 = vmatmul.mubr.bf16.gmra.mrb[20].mxu0 %v3035_v5 }
 0x180   :  { %884 = vmatpush1.bf16.msra.mxu1 %v2554_v6  ;;  %907 = vmatprep.mubr.bf16.mxu1 %v2650_v9 }
 0x181   :  { %885 = vmatprep.subr.bf16.mxu1 %v2559_v7 }
 0x184   :  { %886 = vmatpush1.bf16.msra.mxu1 %v2557_v8 }
 0x185   :  { %887 = vmatprep.subr.bf16.mxu1 %v2562_v10 }
 0x188   :  { %888 = vmatpush1.bf16.msra.mxu1 %v2560_v11 }
 0x189   :  { %889 = vmatprep.subr.bf16.mxu1 %v2565_v12 }
 0x18c   :  { %890 = vmatpush1.bf16.msra.mxu1 %v2563_v13 }
 0x18d   :  { %2320 = vmatprep.subr.bf16.mxu1 %v2651_v16 }
 0x18f   :  { %908 = vmatmul.mubr.bf16.vlgmr.msra.gmra.mrb[12].mxu1 %v3009_v46 }
 0x190   :  { %2321 = vmatpush3.bf16.msra.mxu1 %v2566_v14  ;;  %917 = vmatprep.mubr.bf16.mxu1 %v2650_v9 }
 0x191   :  { %2322 = vmatprep.subr.bf16.mxu1 %v2651_v16 }
 0x194   :  { %2323 = vmatpush3.bf16.msra.mxu1 %v2567_v17 }
 0x195   :  { %2324 = vmatprep.subr.bf16.mxu1 %v2651_v16 }
 0x197   :  { %918 = vmatmul.mubr.bf16.gmra.mrb[16].mxu1 %v3030_v3 }
 0x198   :  { %2325 = vmatpush3.bf16.msra.mxu1 %v2568_v18  ;;  %927 = vmatprep.mubr.bf16.mxu1 %v2650_v9  ;;  %v2572_v9 = vld [vmem:[%s3596_s3 + $0x168] ss:$28 sps:$4 sm:$0xff]   ;;  %s2653_s3 = smov 32  }
 0x199   :  { %2326 = vmatprep.subr.bf16.mxu1 %v2651_v16 }
 0x19c   :  { %2327 = vmatpush3.bf16.msra.mxu1 %v2569_v20 }
 0x19d   :  { %2328 = vmatprep.subr.bf16.mxu1 %v2651_v16 }
 0x19f   :  { %928 = vmatmul.mubr.bf16.gmra.mrb[20].mxu1 %v3035_v5 }
 0x1a0   :  { %2329 = vmatpush3.bf16.msra.mxu1 %v2570_v21  ;;  %2336 = vmatprep.mubr.msk.bf16.mxu1 %vm2652_vm9, %v2651_v16 }
 0x1a1   :  { %2330 = vmatprep.subr.bf16.mxu1 %v2651_v16 }
 0x1a4   :  { %2331 = vmatpush3.bf16.msra.mxu1 %v2571_v22 }
 0x1a5   :  { %2332 = vmatprep.subr.bf16.mxu1 %v2651_v16 }
 0x1a8   :  { %2333 = vmatpush3.bf16.msra.mxu1 %v2572_v9 }
 0x1a9   :  { %2334 = vmatprep.subr.bf16.mxu1 %v2651_v16 }
 0x1ac   :  { %2335 = vmatpush3.bf16.msra.mxu1 %v2573_v23 }
 0x1af   :  { %2337 = vmatmul.mubr.bf16.vlgmr.msra.gmra.mrb[24].mxu1 %v3009_v46 }
 0x1b0   :  { %2340 = vmatprep.mubr.msk.bf16.mxu1 %vm2652_vm9, %v2651_v16 }
 0x1b7   :  { %2341 = vmatmul.mubr.bf16.gmra.mrb[28].mxu1 %v3030_v3 }
 0x1b8   :  { %2344 = vmatprep.mubr.msk.bf16.mxu1 %vm2652_vm9, %v2651_v16 }
 0x1bf   :  { %2345 = vmatmul.mubr.bf16.gmra.mrb[32].mxu1 %v3035_v5 }
 0x242   :  { %v3117_v2 = vpop.f32.mrb[0].mxu1  ;;  %v972_v15 = vpop.f32.mrb[12].mxu0 }
 0x243   :  { %v3119_v24 = vpop.f32.mrb[1].mxu1  ;;  %v974_v25 = vpop.f32.mrb[13].mxu0  ;;  %v1250_v28 = vrot.slane %v972_v15, 6 }
 0x244   :  { %v3121_v26 = vpop.f32.mrb[2].mxu1  ;;  %v975_v27 = vpop.f32.mrb[14].mxu0  ;;  %v1068_v32 = vrot.slane %v3119_v24, 2 }
 0x245   :  { %v1251_v29 = vrot.slane %v975_v27, 6  ;;  %v3123_v30 = vpop.f32.mrb[3].mxu1  ;;  %v3125_v31 = vpop.f32.mrb[15].mxu0 }
 0x246   :  { %v1069_v33 = vrot.slane %v3123_v30, 2 }
 0x247   :  { %v1252_v34 = vsel %vm1246_vm10, %v1250_v28, %v1251_v29 }
 0x248   :  { %1277 = vrot.lane.b32.xlu1 %v1252_v34, %s2653_s3  ;;  %v1070_v36 = vsel %vm66_vm2, %v1068_v32, %v1069_v33 }
 0x249   :  { %1096 = vrot.lane.b32.xlu0 %v1070_v36, %s2654_s21 }
 0x24a   :  { %v3133_v37 = vpop.f32.mrb[4].mxu1  ;;  %v981_v38 = vpop.f32.mrb[16].mxu0 }
 0x24b   :  { %v1255_v39 = vrot.slane %v981_v38, 6  ;;  %v3135_v40 = vpop.f32.mrb[5].mxu1  ;;  %v3137_v41 = vpop.f32.mrb[17].mxu0 }
 0x24c   :  { %v1074_v42 = vrot.slane %v3135_v40, 2  ;;  %v3140_v43 = vpop.f32.mrb[6].mxu1  ;;  %v985_v44 = vpop.f32.mrb[18].mxu0 }
 0x24d   :  { %v1259_v45 = vrot.slane %v985_v44, 6  ;;  %v3142_v46 = vpop.f32.mrb[7].mxu1  ;;  %v3144_v47 = vpop.f32.mrb[19].mxu0  ;;  %v3147_v48 = vsel %vm1246_vm10, %v1251_v29, %v1255_v39 }
 0x24e   :  { %v1078_v35 = vrot.slane %v3142_v46, 2  ;;  %v1075_v49 = vsel %vm66_vm2, %v1069_v33, %v1074_v42 }
 0x24f   :  { %1100 = vrot.lane.b32.xlu0 %v1075_v49, %s2654_s21  ;;  %v3153_v19 = vsel %vm1246_vm10, %v1255_v39, %v1259_v45 }
 0x250   :  { %v3156_v50 = vsel %vm66_vm2, %v1074_v42, %v1078_v35 }
 0x252   :  { %v3158_v51 = vpop.f32.mrb[8].mxu1  ;;  %v991_v52 = vpop.f32.mrb[20].mxu0 }
 0x253   :  { %v1263_v53 = vrot.slane %v991_v52, 6  ;;  %v3160_v54 = vpop.f32.mrb[9].mxu1  ;;  %v3162_v55 = vpop.f32.mrb[21].mxu0 }
 0x254   :  { %v1082_v56 = vrot.slane %v3160_v54, 2  ;;  %v3165_v57 = vpop.f32.mrb[10].mxu1  ;;  %v3167_v58 = vpop.f32.mrb[22].mxu0 }
 0x255   :  { %v1267_v59 = vrot.slane %v3167_v58, 6  ;;  %v3170_v60 = vpop.f32.mrb[11].mxu1  ;;  %v3172_v61 = vpop.f32.mrb[23].mxu0  ;;  %v1264_v62 = vsel %vm1246_vm10, %v1259_v45, %v1263_v53 }
 0x256   :  { %v1086_v63 = vrot.slane %v3170_v60, 2  ;;  %1289 = vrot.lane.b32.xlu1 %v1264_v62, %s2653_s3  ;;  %v1083_v3 = vsel %vm66_vm2, %v1078_v35, %v1082_v56 }
 0x257   :  { %1108 = vrot.lane.b32.xlu0 %v1083_v3, %s2654_s21  ;;  %v1268_v4 = vsel %vm1246_vm10, %v1263_v53, %v1267_v59 }
 0x258   :  { %v1087_v5 = vsel %vm66_vm2, %v1082_v56, %v1086_v63 }
 0x25a   :  { %1293 = vrot.lane.b32.xlu1 %v1268_v4, %s2653_s3 }
 0x25b   :  { %1112 = vrot.lane.b32.xlu0 %v1087_v5, %s2654_s21 }
 0x262   :  { %v909_v1 = vpop.f32.mrb[12].mxu1 }
 0x263   :  { %v911_v0 = vpop.f32.mrb[13].mxu1  ;;  %v1071_v7 = vrot.slane %v909_v1, 2  ;;  %v1157_v8 = vrot.slane %v909_v1, 4 }
 0x264   :  { %v913_v6 = vpop.f32.mrb[14].mxu1  ;;  %v1160_v13 = vrot.slane %v911_v0, 4  ;;  %v1247_v14 = vrot.slane %v911_v0, 6 }
 0x265   :  { %v1072_v10 = vrot.slane %v913_v6, 2  ;;  %v1158_v11 = vrot.slane %v913_v6, 4  ;;  %v915_v12 = vpop.f32.mrb[15].mxu1 }
 0x266   :  { %v1161_v17 = vrot.slane %v915_v12, 4  ;;  %v1248_v18 = vrot.slane %v915_v12, 6 }
 0x267   :  { %v1159_v20 = vsel %vm96_vm3, %v1157_v8, %v1158_v11  ;;  %v1073_v21 = vsel %vm66_vm2, %v1071_v7, %v1072_v10 }
 0x268   :  { %1185 = vrot.lane.b32.xlu0 %v1159_v20, %s2655_s22  ;;  %1098 = vrot.lane.b32.xlu1 %v1073_v21, %s2654_s21  ;;  %v1249_v22 = vsel %vm1246_vm10, %v1247_v14, %v1248_v18  ;;  %v1162_v9 = vsel %vm96_vm3, %v1160_v13, %v1161_v17 }
 0x26a   :  { %v919_v23 = vpop.f32.mrb[16].mxu1 }
 0x26b   :  { %v1076_v15 = vrot.slane %v919_v23, 2  ;;  %v1163_v25 = vrot.slane %v919_v23, 4  ;;  %v921_v27 = vpop.f32.mrb[17].mxu1 }
 0x26c   :  { %v1165_v28 = vrot.slane %v921_v27, 4  ;;  %v1253_v29 = vrot.slane %v921_v27, 6  ;;  %1275 = vrot.lane.b32.xlu0 %v1249_v22, %s2653_s3  ;;  %1187 = vrot.lane.b32.xlu1 %v1162_v9, %s2655_s22  ;;  %v923_v32 = vpop.f32.mrb[18].mxu1 }
 0x26d   :  { %v1080_v33 = vrot.slane %v923_v32, 2  ;;  %v1167_v34 = vrot.slane %v923_v32, 4  ;;  %v925_v36 = vpop.f32.mrb[19].mxu1  ;;  %v1164_v38 = vsel %vm96_vm3, %v1158_v11, %v1163_v25  ;;  %v1077_v39 = vsel %vm66_vm2, %v1072_v10, %v1076_v15 }
 0x26e   :  { %v1169_v42 = vrot.slane %v925_v36, 4  ;;  %v1257_v44 = vrot.slane %v925_v36, 6  ;;  %v1166_v45 = vsel %vm96_vm3, %v1161_v17, %v1165_v28  ;;  %v1254_v35 = vsel %vm1246_vm10, %v1248_v18, %v1253_v29 }
 0x26f   :  { %v1081_v49 = vsel %vm66_vm2, %v1076_v15, %v1080_v33  ;;  %v1168_v52 = vsel %vm96_vm3, %v1163_v25, %v1167_v34 }
 0x270   :  { %1189 = vrot.lane.b32.xlu0 %v1164_v38, %s2655_s22  ;;  %1102 = vrot.lane.b32.xlu1 %v1077_v39, %s2654_s21  ;;  %v1170_v53 = vsel %vm96_vm3, %v1165_v28, %v1169_v42  ;;  %v1258_v56 = vsel %vm1246_vm10, %v1253_v29, %v1257_v44 }
 0x272   :  { %v929_v62 = vpop.f32.mrb[20].mxu1 }
 0x273   :  { %v1084_v3 = vrot.slane %v929_v62, 2  ;;  %v1171_v4 = vrot.slane %v929_v62, 4  ;;  %v931_v5 = vpop.f32.mrb[21].mxu1 }
 0x274   :  { %v1173_v1 = vrot.slane %v931_v5, 4  ;;  %v1261_v0 = vrot.slane %v931_v5, 6  ;;  %1191 = vrot.lane.b32.xlu1 %v1166_v45, %s2655_s22  ;;  %v933_v6 = vpop.f32.mrb[22].mxu1  ;;  %v1272_v45 = vsel %vm1246_vm10, %v1267_v59, 0.0 }
 0x275   :  { %v1088_v7 = vrot.slane %v933_v6, 2  ;;  %v1175_v8 = vrot.slane %v933_v6, 4  ;;  %v935_v10 = vpop.f32.mrb[23].mxu1  ;;  %v1172_v11 = vsel %vm96_vm3, %v1167_v34, %v1171_v4  ;;  %v1085_v12 = vsel %vm66_vm2, %v1080_v33, %v1084_v3 }
 0x276   :  { %v1177_v13 = vrot.slane %v935_v10, 4  ;;  %v1265_v14 = vrot.slane %v935_v10, 6  ;;  %1197 = vrot.lane.b32.xlu0 %v1172_v11, %s2655_s22  ;;  %v1262_v17 = vsel %vm1246_vm10, %v1257_v44, %v1261_v0  ;;  %v1174_v18 = vsel %vm96_vm3, %v1169_v42, %v1173_v1 }
 0x277   :  { %v1176_v20 = vsel %vm96_vm3, %v1171_v4, %v1175_v8  ;;  %v1089_v21 = vsel %vm66_vm2, %v1084_v3, %v1088_v7  ;;  %v1092_v34 = vsel %vm66_vm2, %v1086_v63, 0.0  ;;  %v1093_v36 = vsel %vm66_vm2, %v1088_v7, 0.0 }
 0x278   :  { %1110 = vrot.lane.b32.xlu1 %v1085_v12, %s2654_s21  ;;  %v1266_v22 = vsel %vm1246_vm10, %v1261_v0, %v1265_v14  ;;  %v1178_v9 = vsel %vm96_vm3, %v1173_v1, %v1177_v13  ;;  %v1181_v42 = vsel %vm96_vm3, %v1175_v8, 0.0  ;;  %v1182_v63 = vsel %vm96_vm3, %v1177_v13, 0.0 }
 0x279   :  { %v1271_v44 = vsel %vm1246_vm10, %v1265_v14, 0.0 }
 0x27a   :  { %1287 = vrot.lane.b32.xlu0 %v1262_v17, %s2653_s3 }
 0x27c   :  { %1199 = vrot.lane.b32.xlu1 %v1174_v18, %s2655_s22 }
 0x27e   :  { %1201 = vrot.lane.b32.xlu0 %v1176_v20, %s2655_s22 }
 0x280   :  { %1114 = vrot.lane.b32.xlu1 %v1089_v21, %s2654_s21 }
 0x282   :  { %1291 = vrot.lane.b32.xlu0 %v1266_v22, %s2653_s3  ;;  %v1034_v23 = vpop.f32.mrb[24].mxu1 }
 0x283   :  { %v2338_v15 = vpop.f32.mrb[25].mxu1 }
 0x284   :  { %1203 = vrot.lane.b32.xlu1 %v1178_v9, %s2655_s22  ;;  %v1036_v25 = vpop.f32.mrb[26].mxu1 }
 0x285   :  { %v2339_v27 = vpop.f32.mrb[27].mxu1 }
 0x286   :  { %1279 = vrot.lane.b32.xlu0 %v1254_v35, %s2653_s3 }
 0x288   :  { %1281 = vrot.lane.b32.xlu1 %v3147_v48, %s2653_s3 }
 0x28a   :  { %1104 = vrot.lane.b32.xlu0 %v3156_v50, %s2654_s21  ;;  %v3227_v28 = vpop.f32.mrb[28].mxu1 }
 0x28b   :  { %v2342_v29 = vpop.f32.mrb[29].mxu1 }
 0x28c   :  { %1106 = vrot.lane.b32.xlu1 %v1081_v49, %s2654_s21  ;;  %v3230_v32 = vpop.f32.mrb[30].mxu1 }
 0x28d   :  { %v2343_v33 = vpop.f32.mrb[31].mxu1 }
 0x28e   :  { %1116 = vrot.lane.b32.xlu0 %v1092_v34, %s2654_s21 }
 0x290   :  { %1118 = vrot.lane.b32.xlu1 %v1093_v36, %s2654_s21 }
 0x292   :  { %1193 = vrot.lane.b32.xlu0 %v1168_v52, %s2655_s22  ;;  %v1049_v48 = vpop.f32.mrb[32].mxu1 }
 0x293   :  { %v2346_v50 = vpop.f32.mrb[33].mxu1 }
 0x294   :  { %1195 = vrot.lane.b32.xlu1 %v1170_v53, %s2655_s22  ;;  %v3240_v38 = vpop.f32.mrb[34].mxu1 }
 0x295   :  { %v2347_v39 = vpop.f32.mrb[35].mxu1 }
 0x296   :  { %1205 = vrot.lane.b32.xlu0 %v1181_v42, %s2655_s22 }
 0x298   :  { %1285 = vrot.lane.b32.xlu1 %v3153_v19, %s2653_s3 }
 0x29a   :  { %1283 = vrot.lane.b32.xlu0 %v1258_v56, %s2653_s3 }
 0x29c   :  { %1207 = vrot.lane.b32.xlu1 %v1182_v63, %s2655_s22 }
 0x29e   :  { %1295 = vrot.lane.b32.xlu0 %v1271_v44, %s2653_s3 }
 0x2a0   :  { %1297 = vrot.lane.b32.xlu1 %v1272_v45, %s2653_s3 }
 0x2ba   :  { %v1278_v49 = vpop.permute.xlu1 %1277 }
 0x2bb   :  { %v1097_v35 = vpop.permute.xlu0 %1096 }
 0x2c1   :  { %v1101_v52 = vpop.permute.xlu0 %1100 }
 0x2c8   :  { %v1290_v19 = vpop.permute.xlu1 %1289 }
 0x2c9   :  { %v1109_v53 = vpop.permute.xlu0 %1108 }
 0x2cc   :  { %v1294_v56 = vpop.permute.xlu1 %1293 }
 0x2cd   :  { %v1113_v62 = vpop.permute.xlu0 %1112 }
 0x2da   :  { %v1186_v3 = vpop.permute.xlu0 %1185  ;;  %v1099_v4 = vpop.permute.xlu1 %1098 }
 0x2db   :  { %v1121_v5 = vsel %vm1120_vm11, %v1097_v35, %v1099_v4  ;;  %v1140_v1 = vadd.f32 %v1099_v4, %v3119_v24 }
 0x2dc   :  { %v1139_v58 = vadd.f32 %v1121_v5, %v3117_v2 }
 0x2de   :  { %v1276_v59 = vpop.permute.xlu0 %1275  ;;  %v1188_v0 = vpop.permute.xlu1 %1187 }
 0x2df   :  { %v1210_v6 = vsel %vm1209_vm12, %v1186_v3, %v1188_v0  ;;  %v1229_v7 = vadd.f32 %v1188_v0, %v1140_v1  ;;  %v1300_v10 = vsel %vm1299_vm13, %v1276_v59, %v1278_v49 }
 0x2e0   :  { %v1228_v8 = vadd.f32 %v1210_v6, %v1139_v58 }
 0x2e1   :  { %v1319_v11 = vadd.f32 %v1278_v49, %v1229_v7 }
 0x2e2   :  { %v1318_v12 = vadd.f32 %v1300_v10, %v1228_v8  ;;  %v1103_v13 = vpop.permute.xlu1 %1102  ;;  %v1190_v17 = vpop.permute.xlu0 %1189 }
 0x2e3   :  { %v3260_v14 = vadd.f32 %v1319_v11, %v1036_v25  ;;  %v1142_v49 = vadd.f32 %v1103_v13, %v3123_v30 }
 0x2e4   :  { %v3263_v18 = vadd.f32 %v1318_v12, %v3125_v31 }
 0x2e6   :  { %v1192_v24 = vpop.permute.xlu1 %1191 }
 0x2e7   :  { %v1231_v5 = vadd.f32 %v1192_v24, %v1142_v49 }
 0x2e8   :  { %v1198_v2 = vpop.permute.xlu0 %1197 }
 0x2ea   :  { %v1111_v20 = vpop.permute.xlu1 %1110 }
 0x2eb   :  { %v1124_v21 = vsel %vm1120_vm11, %v1109_v53, %v1111_v20  ;;  %v1146_v9 = vadd.f32 %v1111_v20, %v3142_v46  ;;  %v1122_v46 = vsel %vm1120_vm11, %v1101_v52, %v1103_v13  ;;  %v1211_v53 = vsel %vm1209_vm12, %v1190_v17, %v1192_v24 }
 0x2ec   :  { %v1288_v22 = vpop.permute.xlu0 %1287  ;;  %v1145_v23 = vadd.f32 %v1124_v21, %v3140_v43  ;;  %v1357_v13 = vrot.slane %v3260_v14, 2 }
 0x2ed   :  { %v1303_v34 = vsel %vm1299_vm13, %v1288_v22, %v1290_v19  ;;  %v1354_v22 = vrot.slane %v3263_v18, 2 }
 0x2ee   :  { %v1200_v15 = vpop.permute.xlu1 %1199 }
 0x2ef   :  { %v1213_v27 = vsel %vm1209_vm12, %v1198_v2, %v1200_v15  ;;  %v1235_v29 = vadd.f32 %v1200_v15, %v1146_v9 }
 0x2f0   :  { %v1234_v25 = vadd.f32 %v1213_v27, %v1145_v23  ;;  %v1202_v33 = vpop.permute.xlu0 %1201 }
 0x2f1   :  { %v1325_v31 = vadd.f32 %v1290_v19, %v1235_v29 }
 0x2f2   :  { %v1324_v36 = vadd.f32 %v1303_v34, %v1234_v25  ;;  %v1115_v50 = vpop.permute.xlu1 %1114 }
 0x2f3   :  { %v1337_v39 = vadd.f32 %v1325_v31, %v1049_v48  ;;  %v1125_v42 = vsel %vm1120_vm11, %v1113_v62, %v1115_v50  ;;  %v1148_v43 = vadd.f32 %v1115_v50, %v3160_v54  ;;  %v1141_v48 = vadd.f32 %v1122_v46, %v3121_v26 }
 0x2f4   :  { %v1292_v63 = vpop.permute.xlu0 %1291  ;;  %v1336_v44 = vadd.f32 %v1324_v36, %v3162_v55  ;;  %v1147_v45 = vadd.f32 %v1125_v42, %v3158_v51 }
 0x2f5   :  { %v1304_v55 = vsel %vm1299_vm13, %v1292_v63, %v1294_v56  ;;  %v1230_v1 = vadd.f32 %v1211_v53, %v1141_v48  ;;  %v1367_v7 = vrot.slane %v1337_v39, 2 }
 0x2f6   :  { %v1204_v35 = vpop.permute.xlu1 %1203 }
 0x2f7   :  { %v1214_v19 = vsel %vm1209_vm12, %v1202_v33, %v1204_v35  ;;  %v1237_v3 = vadd.f32 %v1204_v35, %v1148_v43 }
 0x2f8   :  { %v1236_v62 = vadd.f32 %v1214_v19, %v1147_v45  ;;  %v1280_v4 = vpop.permute.xlu0 %1279 }
 0x2f9   :  { %v1327_v52 = vadd.f32 %v1294_v56, %v1237_v3 }
 0x2fa   :  { %v1326_v54 = vadd.f32 %v1304_v55, %v1236_v62  ;;  %v1282_v58 = vpop.permute.xlu1 %1281 }
 0x2fb   :  { %v3281_v51 = vadd.f32 %v1327_v52, %v3240_v38  ;;  %v1301_v30 = vsel %vm1299_vm13, %v1280_v4, %v1282_v58  ;;  %v1321_v59 = vadd.f32 %v1282_v58, %v1231_v5  ;;  %v1364_v38 = vrot.slane %v1336_v44, 2 }
 0x2fc   :  { %v3285_v0 = vadd.f32 %v1326_v54, %v3172_v61  ;;  %v1320_v6 = vadd.f32 %v1301_v30, %v1230_v1  ;;  %v1105_v26 = vpop.permute.xlu0 %1104 }
 0x2fd   :  { %v1368_v8 = vrot.slane %v3281_v51, 2  ;;  %v1333_v10 = vadd.f32 %v1321_v59, %v3227_v28 }
 0x2fe   :  { %v1365_v56 = vrot.slane %v3285_v0, 2  ;;  %v1332_v11 = vadd.f32 %v1320_v6, %v3137_v41  ;;  %v1107_v12 = vpop.permute.xlu1 %1106 }
 0x2ff   :  { %v1358_v17 = vrot.slane %v1333_v10, 2  ;;  %v1369_v24 = vsel %vm66_vm2, %v1367_v7, %v1368_v8  ;;  %v1123_v33 = vsel %vm1120_vm11, %v1105_v26, %v1107_v12  ;;  %v1144_v34 = vadd.f32 %v1107_v12, %v3135_v40  ;;  %v2576_v7 = vld [vmem:[%s3598_s5 + $0x48] sm:$0xff]   ;;  %v2581_v12 = vld [vmem:[%s3598_s5 + $0x18] sm:$0xff]  }
 0x300   :  { %v1355_v61 = vrot.slane %v1332_v11, 2  ;;  %v1117_v2 = vpop.permute.xlu0 %1116  ;;  %v3293_v20 = vmax.f32 %v1337_v39, %v1369_v24  ;;  %v1366_v21 = vsel %vm66_vm2, %v1364_v38, %v1365_v56  ;;  %v1143_v50 = vadd.f32 %v1123_v33, %v3133_v37  ;;  %v2582_v38 = vld [vmem:[%s3598_s5 + $0x60] sm:$0xff]   ;;  %v2585_v24 = vld [vmem:[%s3598_s5 + $0x28] sm:$0xff]  }
 0x301   :  { %v3297_v28 = vmax.f32 %v1336_v44, %v1366_v21  ;;  %v1359_v9 = vsel %vm66_vm2, %v1357_v13, %v1358_v17  ;;  %v2583_v13 = vld [vmem:[%s3598_s5 + $0x20] sm:$0xff]   ;;  %v2586_v21 = vld [vmem:[%s3598_s5 + $0x70] sm:$0xff]  }
 0x302   :  { %v1119_v41 = vpop.permute.xlu1 %1118  ;;  %1408 = vrot.lane.b32.xlu1 %v3293_v20, %s2656_s23  ;;  %v3303_v23 = vmax.f32 %v3260_v14, %v1359_v9  ;;  %v1356_v15 = vsel %vm66_vm2, %v1354_v22, %v1355_v61  ;;  %v2587_v9 = vld [vmem:[%s3598_s5 + $0x30] sm:$0xff]  }
 0x303   :  { %1406 = vrot.lane.b32.xlu0 %v3297_v28, %s2656_s23  ;;  %v3309_v27 = vmax.f32 %v3263_v18, %v1356_v15  ;;  %v1126_v44 = vsel %vm1120_vm11, %v1117_v2, %v1119_v41  ;;  %v1150_v35 = vadd.f32 %v1119_v41, %v3170_v60  ;;  %v1439_v41 = vld [vmem:[%s3597_s4] sm:$0x3] }
 0x304   :  { %v1194_v29 = vpop.permute.xlu0 %1193  ;;  %v1149_v19 = vadd.f32 %v1126_v44, %v3165_v57 }
 0x306   :  { %v1196_v25 = vpop.permute.xlu1 %1195  ;;  %1400 = vrot.lane.b32.xlu1 %v3303_v23, %s2656_s23 }
 0x307   :  { %1398 = vrot.lane.b32.xlu0 %v3309_v27, %s2656_s23  ;;  %v1212_v31 = vsel %vm1209_vm12, %v1194_v29, %v1196_v25  ;;  %v1233_v36 = vadd.f32 %v1196_v25, %v1144_v34  ;;  %v2588_v25 = vld [vmem:[%s3598_s5 + $0x78] sm:$0xff]  }
 0x308   :  { %v1206_v14 = vpop.permute.xlu0 %1205  ;;  %v1232_v42 = vadd.f32 %v1212_v31, %v1143_v50  ;;  %v2589_v31 = vld [vmem:[%s3598_s5 + $0x38] sm:$0xff]  }
 0x30a   :  { %v1286_v18 = vpop.permute.xlu1 %1285 }
 0x30b   :  { %v1323_v39 = vadd.f32 %v1286_v18, %v1233_v36  ;;  %v2590_v36 = vld [vmem:[%s3598_s5 + $0xc0] sm:$0xff]  }
 0x30c   :  { %v1284_v63 = vpop.permute.xlu0 %1283  ;;  %2284 = vmatprep.subr.bf16.mxu1 %v2590_v36 }
 0x30d   :  { %v1335_v46 = vadd.f32 %v1323_v39, %v3230_v32  ;;  %v1302_v43 = vsel %vm1299_vm13, %v1284_v63, %v1286_v18  ;;  %v2591_v18 = vld [vmem:[%s3598_s5 + $0x80] sm:$0xff]  }
 0x30e   :  { %v1322_v40 = vadd.f32 %v1302_v43, %v1232_v42  ;;  %v1208_v45 = vpop.permute.xlu1 %1207  ;;  %2285 = vmatpush3.bf16.msra.mxu1 %v2591_v18 }
 0x30f   :  { %v1362_v49 = vrot.slane %v1335_v46, 2  ;;  %v1215_v53 = vsel %vm1209_vm12, %v1206_v14, %v1208_v45  ;;  %v1239_v3 = vadd.f32 %v1208_v45, %v1150_v35  ;;  %v2592_v45 = vld [vmem:[%s3598_s5 + $0xc8] sm:$0xff]  }
 0x310   :  { %v1334_v37 = vadd.f32 %v1322_v40, %v3144_v47  ;;  %v1238_v4 = vadd.f32 %v1215_v53, %v1149_v19  ;;  %v1296_v5 = vpop.permute.xlu0 %1295  ;;  %2286 = vmatprep.subr.bf16.mxu1 %v2592_v45  ;;  %v2594_v19 = vld [vmem:[%s3598_s5 + $0x88] sm:$0xff]  }
 0x311   :  { %v1363_v48 = vsel %vm66_vm2, %v1358_v17, %v1362_v49  ;;  %v2584_v17 = vld [vmem:[%s3598_s5 + $0x68] sm:$0xff]  }
 0x312   :  { %v1360_v62 = vrot.slane %v1334_v37, 2  ;;  %v1298_v32 = vpop.permute.xlu1 %1297  ;;  %v3327_v55 = vmax.f32 %v1333_v10, %v1363_v48  ;;  %v2578_v10 = vld [vmem:[%s3598_s5 + $0x50] sm:$0xff]   ;;  %2287 = vmatpush3.bf16.msra.mxu1 %v2594_v19 }
 0x313   :  { %v1305_v52 = vsel %vm1299_vm13, %v1296_v5, %v1298_v32  ;;  %v1329_v1 = vadd.f32 %v1298_v32, %v1239_v3  ;;  %v2597_v32 = vld [vmem:[%s3598_s5 + $0x90] sm:$0xff]  }
 0x314   :  { %v1328_v60 = vadd.f32 %v1305_v52, %v1238_v4  ;;  %v1361_v54 = vsel %vm66_vm2, %v1355_v61, %v1360_v62  ;;  %v1441_v61 = vlaneseq }
 0x315   :  { %v1372_v58 = vrot.slane %v1329_v1, 2  ;;  %v3331_v30 = vmax.f32 %v1332_v11, %v1361_v54  ;;  %v2580_v11 = vld [vmem:[%s3598_s5 + $0x58] sm:$0xff]  }
 0x316   :  { %v1370_v57 = vrot.slane %v1328_v60, 2  ;;  %v1442_v2 = vshrl.u32 %v1441_v61, 7  ;;  %v2598_v54 = vld [vmem:[%s3598_s5 + $0xd8] sm:$0xff]  }
 0x317   :  { %v1373_v47 = vsel %vm66_vm2, %v1368_v8, %v1372_v58  ;;  %v2577_v8 = vld [vmem:[%s3598_s5 + $0x8] sm:$0xff]  }
 0x318   :  { %v3335_v59 = vmax.f32 %v3281_v51, %v1373_v47  ;;  %v1371_v6 = vsel %vm66_vm2, %v1365_v56, %v1370_v57  ;;  %v2574_v51 = vld [vmem:[%s3598_s5 + $0x40] sm:$0xff]   ;;  %v2579_v56 = vld [vmem:[%s3598_s5 + $0x10] sm:$0xff]   ;;  %v1443_v22 = vsub.s32 0, %v1442_v2  ;;  %v1447_v15 = vsub.s32 1, %v1442_v2  ;;  %v2600_v57 = vld [vmem:[%s3598_s5 + $0x98] sm:$0xff]  }
 0x319   :  { %v3339_v26 = vmax.f32 %v3285_v0, %v1371_v6  ;;  %v2575_v0 = vld [vmem:[%s3598_s5] sm:$0xff]   ;;  %2262 = vmatprep.subr.bf16.mxu0 %v2574_v51 }
 0x31a   :  { %1412 = vrot.lane.b32.xlu1 %v3335_v59, %s2656_s23  ;;  %2263 = vmatpush3.bf16.msra.mxu0 %v2575_v0  ;;  %v3398_v34 = vrot.slane %v1439_v41, %v1443_v22  ;;  %v3410_v39 = vrot.slane %v1439_v41, %v1447_v15  ;;  %v2601_v6 = vld [vmem:[%s3598_s5 + $0xe0] sm:$0xff]   ;;  %v2604_v0 = vld [vmem:[%s3598_s5 + $0xe8] sm:$0xff]  }
 0x31b   :  { %1410 = vrot.lane.b32.xlu0 %v3339_v26, %s2656_s23  ;;  %2264 = vmatprep.subr.bf16.mxu0 %v2576_v7  ;;  %v2603_v51 = vld [vmem:[%s3598_s5 + $0xa0] sm:$0xff]   ;;  %v2606_v7 = vld [vmem:[%s3598_s5 + $0xa8] sm:$0xff]  }
 0x31e   :  { %1404 = vrot.lane.b32.xlu1 %v3327_v55, %s2656_s23  ;;  %2265 = vmatpush3.bf16.msra.mxu0 %v2577_v8 }
 0x31f   :  { %1402 = vrot.lane.b32.xlu0 %v3331_v30, %s2656_s23  ;;  %2266 = vmatprep.subr.bf16.mxu0 %v2578_v10 }
 0x322   :  { %2267 = vmatpush3.bf16.msra.mxu0 %v2579_v56 }
 0x323   :  { %2268 = vmatprep.subr.bf16.mxu0 %v2580_v11 }
 0x326   :  { %2269 = vmatpush3.bf16.msra.mxu0 %v2581_v12 }
 0x327   :  { %2270 = vmatprep.subr.bf16.mxu0 %v2582_v38  ;;  %v2607_v38 = vld [vmem:[%s3598_s5 + $0xf0] sm:$0xff]  }
 0x32a   :  { %2271 = vmatpush3.bf16.msra.mxu0 %v2583_v13 }
 0x32b   :  { %2272 = vmatprep.subr.bf16.mxu0 %v2584_v17  ;;  %v2609_v17 = vld [vmem:[%s3598_s5 + $0xb0] sm:$0xff]  }
 0x32e   :  { %2273 = vmatpush3.bf16.msra.mxu0 %v2585_v24 }
 0x32f   :  { %2274 = vmatprep.subr.bf16.mxu0 %v2586_v21 }
 0x332   :  { %2275 = vmatpush3.bf16.msra.mxu0 %v2587_v9 }
 0x333   :  { %2276 = vmatprep.subr.bf16.mxu0 %v2588_v25  ;;  %v2612_v25 = vld [vmem:[%s3598_s5 + $0xb8] sm:$0xff]  }
 0x336   :  { %2277 = vmatpush3.bf16.msra.mxu0 %v2589_v31 }
 0x337   :  { %2348 = vmatprep.subr.bf16.mxu0 %v2651_v16 }
 0x374   :  { %v1409_v29 = vpop.permute.xlu1 %1408 }
 0x375   :  { %v1429_v33 = vsel %vm323_vm8, %v1409_v29, 0.0  ;;  %v1407_v14 = vpop.permute.xlu0 %1406 }
 0x376   :  { %v1417_v50 = vsel %vm1414_vm14, %v1407_v14, %v1409_v29  ;;  %v1436_v42 = vmax.f32 %v3293_v20, %v1429_v33 }
 0x377   :  { %v1435_v63 = vmax.f32 %v3297_v28, %v1417_v50 }
 0x378   :  { %v1401_v44 = vpop.permute.xlu1 %1400  ;;  %v3423_v28 = vadd.f32 %v3410_v39, %v1436_v42 }
 0x379   :  { %v1455_v46 = vadd.f32 %v3398_v34, %v1435_v63  ;;  %v1427_v43 = vsel %vm323_vm8, %v1401_v44, 0.0  ;;  %v1399_v40 = vpop.permute.xlu0 %1398 }
 0x37a   :  { %v1432_v35 = vmax.f32 %v3303_v23, %v1427_v43  ;;  %v1415_v20 = vsel %vm1414_vm14, %v1399_v40, %v1401_v44  ;;  %v2595_v23 = vld [vmem:[%s3598_s5 + $0xd0] sm:$0xff]  }
 0x37b   :  { %v1463_v49 = vmax.f32 %v1455_v46, 0.0  ;;  %v1431_v53 = vmax.f32 %v3309_v27, %v1415_v20  ;;  %v1464_v27 = vmax.f32 %v3423_v28, 0.0  ;;  %2288 = vmatprep.subr.bf16.mxu1 %v2595_v23  ;;  %v2596_v28 = vld [vmem:[%s3598_s5 + $0x108] sm:$0xff]  }
 0x37c   :  { %v3430_v37 = vadd.f32 %v3410_v39, %v1432_v35  ;;  %2289 = vmatpush3.bf16.msra.mxu1 %v2597_v32  ;;  %v2593_v35 = vld [vmem:[%s3598_s5 + $0x100] sm:$0xff]   ;;  %v2608_v32 = vld [vmem:[%s3598_s5 + $0x128] sm:$0xff]  }
 0x37d   :  { %v1451_v3 = vadd.f32 %v3398_v34, %v1431_v53  ;;  %v1501_v48 = vrot.slane %v1463_v49, 4  ;;  %v1533_v4 = vrot.slane %v1463_v49, 7  ;;  %v1502_v58 = vrot.slane %v1464_v27, 4  ;;  %2290 = vmatprep.subr.bf16.mxu1 %v2598_v54  ;;  %v2599_v49 = vld [vmem:[%s3598_s5 + $0x110] sm:$0xff]   ;;  %v2602_v53 = vld [vmem:[%s3598_s5 + $0x118] sm:$0xff]  }
 0x37e   :  { %v1460_v62 = vmax.f32 %v3430_v37, 0.0 }
 0x37f   :  { %v1459_v5 = vmax.f32 %v1451_v3, 0.0  ;;  %1503 = vrot.lane.b32.xlu0 %v1501_v48, %s2653_s3  ;;  %v2605_v3 = vld [vmem:[%s3598_s5 + $0x120] sm:$0xff]  }
 0x380   :  { %v1470_v60 = vrot.slane %v1460_v62, 4  ;;  %2291 = vmatpush3.bf16.msra.mxu1 %v2600_v57 }
 0x381   :  { %v3443_v52 = vsel %vm1543_vm15, %v1459_v5, %v1533_v4  ;;  %v1469_v1 = vrot.slane %v1459_v5, 4  ;;  %2292 = vmatprep.subr.bf16.mxu1 %v2601_v6 }
 0x382   :  { %v2457_v47 = vpack.i.bf16 %v1470_v60, %v1502_v58  ;;  %v1549_v20 = vpack.c.bf16 %v3443_v52, %v3443_v52 }
 0x383   :  { %1471 = vrot.lane.b32.xlu1 %v1469_v1, %s2653_s3 }
 0x384   :  { %2293 = vmatpush3.bf16.msra.mxu1 %v2603_v51 }
 0x385   :  { %2294 = vmatprep.subr.bf16.mxu1 %v2604_v0 }
 0x387   :  { %2458 = vrot.lane.b32.xlu1 %v2457_v47, %s2653_s3 }
 0x388   :  { %2295 = vmatpush3.bf16.msra.mxu1 %v2606_v7  ;;  %v2611_v7 = vld [vmem:[%s3598_s5 + $0x130] sm:$0xff]  }
 0x389   :  { %2296 = vmatprep.subr.bf16.mxu1 %v2607_v38 }
 0x38c   :  { %v1413_v8 = vpop.permute.xlu1 %1412  ;;  %2297 = vmatpush3.bf16.msra.mxu1 %v2609_v17 }
 0x38d   :  { %v1430_v10 = vsel %vm323_vm8, %v1413_v8, 0.0  ;;  %v1411_v56 = vpop.permute.xlu0 %1410 }
 0x38e   :  { %v1438_v11 = vmax.f32 %v3335_v59, %v1430_v10  ;;  %v1418_v12 = vsel %vm1414_vm14, %v1411_v56, %v1413_v8 }
 0x38f   :  { %v1437_v13 = vmax.f32 %v3339_v26, %v1418_v12  ;;  %v2610_v26 = vld [vmem:[%s3598_s5 + $0xf8] sm:$0xff]  }
 0x390   :  { %v1458_v24 = vadd.f32 %v3410_v39, %v1438_v11  ;;  %v1405_v61 = vpop.permute.xlu1 %1404  ;;  %2298 = vmatprep.subr.bf16.mxu1 %v2610_v26  ;;  %v2615_v26 = vld [vmem:[%s3600_s7 + $0x8] sm:$0xff]  }
 0x391   :  { %v1457_v2 = vadd.f32 %v3398_v34, %v1437_v13  ;;  %v1428_v59 = vsel %vm323_vm8, %v1405_v61, 0.0  ;;  %v1403_v21 = vpop.permute.xlu0 %1402  ;;  %2299 = vmatpush3.bf16.msra.mxu1 %v2612_v25 }
 0x392   :  { %v1466_v22 = vmax.f32 %v1458_v24, 0.0  ;;  %v1434_v9 = vmax.f32 %v3327_v55, %v1428_v59  ;;  %v1416_v41 = vsel %vm1414_vm14, %v1403_v21, %v1405_v61  ;;  %2368 = vmatprep.subr.bf16.mxu1 %v2651_v16  ;;  %v2613_v24 = vld [vmem:[%s3598_s5 + $0x138] sm:$0xff]  }
 0x393   :  { %v1465_v15 = vmax.f32 %v1457_v2, 0.0  ;;  %v1433_v29 = vmax.f32 %v3331_v30, %v1416_v41  ;;  %v2614_v41 = vld [vmem:[%s3600_s7] sm:$0xff]  }
 0x394   :  { %v1454_v33 = vadd.f32 %v3410_v39, %v1434_v9  ;;  %v1520_v30 = vrot.slane %v1466_v22, 4 }
 0x395   :  { %v1453_v14 = vadd.f32 %v3398_v34, %v1433_v29  ;;  %v2452_v31 = vpack.i.bf16 %v1466_v22, %v1465_v15  ;;  %v1519_v50 = vrot.slane %v1465_v15, 4  ;;  %v2616_v15 = vld [vmem:[%s3600_s7 + $0x10] sm:$0xff]   ;;  %v2617_v29 = vld [vmem:[%s3600_s7 + $0x18] sm:$0xff]  }
 0x396   :  { %v1462_v55 = vmax.f32 %v1454_v33, 0.0 }
 0x397   :  { %v1461_v36 = vmax.f32 %v1453_v14, 0.0  ;;  %2453 = vrot.lane.b32.xlu0 %v2452_v31, %s2655_s22 }
 0x398   :  { %v1488_v34 = vrot.slane %v1462_v55, 4 }
 0x399   :  { %v2462_v18 = vpack.i.bf16 %v1462_v55, %v1461_v36  ;;  %v1487_v42 = vrot.slane %v1461_v36, 4  ;;  %v2204_v36 = vld [vmem:[%s3599_s6] ss:$0 sm:$0xff]  ;;  %s2657_s6 = smov [#allocation2]  }
 0x39b   :  { %1521 = vrot.lane.b32.xlu0 %v1519_v50, %s2654_s21  ;;  %2463 = vrot.lane.b32.xlu1 %v2462_v18, %s2655_s22 }
 0x39f   :  { %1523 = vrot.lane.b32.xlu1 %v1520_v30, %s2654_s21  ;;  %1489 = vrot.lane.b32.xlu0 %v1487_v42, %s2654_s21 }
 0x3a3   :  { %1491 = vrot.lane.b32.xlu0 %v1488_v34, %s2654_s21 }
 0x3f1   :  { %v1504_v39 = vpop.permute.xlu0 %1503 }
 0x3f2   :  { %v1527_v63 = vsel %vm1299_vm13, %v1464_v27, %v1504_v39 }
 0x3f3   :  { %v1534_v44 = vrot.slane %v1527_v63, 7 }
 0x3f5   :  { %v1472_v46 = vpop.permute.xlu1 %1471 }
 0x3f6   :  { %v1496_v43 = vsel %vm1299_vm13, %v1460_v62, %v1472_v46 }
 0x3f7   :  { %v1545_v40 = vsel %vm1543_vm15, %v1496_v43, %v1534_v44 }
 0x3f8   :  { %v1550_v45 = vpack.c.bf16 %v1545_v40, %v1545_v40 }
 0x3f9   :  { %v2459_v19 = vpop.permute.xlu1 %2458 }
 0x3fa   :  { %1913 = vmatprep.mubr.bf16.mxu0 %v1550_v45  ;;  %v2460_v37 = vunpack.i.l.bf16 %v2459_v19  ;;  %v2461_v27 = vunpack.i.h.bf16 %v2459_v19 }
 0x3fb   :  { %1914 = vmatmul.mubr.bf16.vlgmr.msra.gmra.mrb[24].mxu0 %v1549_v20  ;;  %v2245_v20 = vld [vmem:[%s3601_s8] ss:$0 sm:$0xff]  ;;  %s2113_s8 = sshll.u32 %s2657_s6, 4  ;;  %s2114_s8 = int_to_ptr.vmem [resolvable:$true] %s2113_s8 }
 0x3fc   :  { %2349 = vmatpush3.bf16.msra.mxu0 %v2593_v35  ;;  %2364 = vmatprep.mubr.msk.bf16.mxu0 %vm2652_vm9, %v2651_v16  ;;  %v1507_v4 = vsel %vm1299_vm13, %v1504_v39, %v2460_v37  ;;  %v1475_v47 = vsel %vm1299_vm13, %v1472_v46, %v2461_v27  ;;  %s2622_s22 = scalar_lea.vmem %s2114_s8, 32  ;;  %p2627_p1 = scmp.lt.s32.totalorder %s2114_s8, %s2114_s8 }
 0x3fd   :  { %2350 = vmatprep.subr.bf16.mxu0 %v2651_v16  ;;  %p2623_p0 = scmp.ne.s32.totalorder %s2114_s8, %s2622_s22  ;;  %p2628_p2 = scmp.lt.s32.totalorder %s2622_s22, %s2622_s22 }
 0x3ff   :  { %p2629_p3 = por %p2628_p2, %p2627_p1 }
 0x400   :  { %2351 = vmatpush3.bf16.msra.mxu0 %v2596_v28 }
 0x401   :  { %2352 = vmatprep.subr.bf16.mxu0 %v2651_v16  ;;  %p2630_p4 = pnand %p2629_p3, %p2623_p0 }
 0x404   :  { %2353 = vmatpush3.bf16.msra.mxu0 %v2599_v49 }
 0x405   :  { %2354 = vmatprep.subr.bf16.mxu0 %v2651_v16 }
 0x408   :  { %2355 = vmatpush3.bf16.msra.mxu0 %v2602_v53 }
 0x409   :  { %v2454_v48 = vpop.permute.xlu0 %2453  ;;  %2356 = vmatprep.subr.bf16.mxu0 %v2651_v16 }
 0x40a   :  { %v2456_v23 = vunpack.i.h.bf16 %v2454_v48  ;;  %v2455_v62 = vunpack.i.l.bf16 %v2454_v48 }
 0x40c   :  { %2357 = vmatpush3.bf16.msra.mxu0 %v2605_v3  ;;  %v1516_v5 = vsel %vm1209_vm12, %v2455_v62, %v2456_v23  ;;  %v1528_v52 = vsel %vm1209_vm12, %v1507_v4, %v2455_v62 }
 0x40d   :  { %v1522_v1 = vpop.permute.xlu0 %1521  ;;  %v2464_v60 = vpop.permute.xlu1 %2463  ;;  %2358 = vmatprep.subr.bf16.mxu0 %v2651_v16  ;;  %v1535_v6 = vrot.slane %v1528_v52, 7 }
 0x40e   :  { %v1529_v54 = vsel %vm1120_vm11, %v1516_v5, %v1522_v1  ;;  %v2466_v58 = vunpack.i.h.bf16 %v2464_v60  ;;  %v2465_v57 = vunpack.i.l.bf16 %v2464_v60 }
 0x40f   :  { %v1536_v8 = vrot.slane %v1529_v54, 7 }
 0x410   :  { %v1497_v51 = vsel %vm1209_vm12, %v1475_v47, %v2465_v57  ;;  %2359 = vmatpush3.bf16.msra.mxu0 %v2608_v32  ;;  %v1484_v0 = vsel %vm1209_vm12, %v2465_v57, %v2466_v58 }
 0x411   :  { %v1490_v10 = vpop.permute.xlu0 %1489  ;;  %v1524_v56 = vpop.permute.xlu1 %1523  ;;  %2360 = vmatprep.subr.bf16.mxu0 %v2651_v16  ;;  %v1546_v11 = vsel %vm1543_vm15, %v1497_v51, %v1535_v6 }
 0x412   :  { %v1498_v12 = vsel %vm1120_vm11, %v1484_v0, %v1490_v10  ;;  %v1525_v38 = vsel %vm1120_vm11, %v1522_v1, %v1524_v56  ;;  %v1551_v61 = vpack.c.bf16 %v1546_v11, %v1546_v11 }
 0x413   :  { %v1547_v13 = vsel %vm1543_vm15, %v1498_v12, %v1536_v8  ;;  %v1537_v2 = vrot.slane %v1525_v38, 7 }
 0x414   :  { %2361 = vmatpush3.bf16.msra.mxu0 %v2611_v7  ;;  %v1552_v17 = vpack.c.bf16 %v1547_v13, %v1547_v13 }
 0x415   :  { %v1492_v59 = vpop.permute.xlu0 %1491  ;;  %2362 = vmatprep.subr.bf16.mxu0 %v2651_v16 }
 0x416   :  { %v1493_v21 = vsel %vm1120_vm11, %v1490_v10, %v1492_v59  ;;  %1953 = vmatprep.mubr.bf16.mxu1 %v1552_v17 }
 0x417   :  { %v1548_v22 = vsel %vm1543_vm15, %v1493_v21, %v1537_v2  ;;  %1954 = vmatmul.mubr.bf16.vlgmr.msra.gmra.mrb[36].mxu1 %v1551_v61 }
 0x418   :  { %v1553_v9 = vpack.c.bf16 %v1548_v22, %v1548_v22  ;;  %2363 = vmatpush3.bf16.msra.mxu0 %v2613_v24  ;;  %2376 = vmatprep.mubr.msk.bf16.mxu1 %vm2652_vm9, %v2651_v16 }
 0x419   :  { %2369 = vmatpush3.bf16.msra.mxu1 %v2614_v41 }
 0x41a   :  { %2370 = vmatprep.subr.bf16.mxu1 %v2651_v16 }
 0x41b   :  { %2365 = vmatmul.mubr.bf16.vlgmr.msra.gmra.mrb[28].mxu0 %v1553_v9 }
 0x41d   :  { %2371 = vmatpush3.bf16.msra.mxu1 %v2615_v26 }
 0x41e   :  { %2372 = vmatprep.subr.bf16.mxu1 %v2651_v16 }
 0x421   :  { %2373 = vmatpush3.bf16.msra.mxu1 %v2616_v15 }
 0x422   :  { %2374 = vmatprep.subr.bf16.mxu1 %v2651_v16 }
 0x425   :  { %2375 = vmatpush3.bf16.msra.mxu1 %v2617_v29 }
 0x4ce   :  { %v2278_v25 = vpop.f32.mrb[24].mxu0 }
 0x4cf   :  { %v2279_v33 = vpop.f32.mrb[25].mxu0 }
 0x4d0   :  { %v2280_v14 = vadd.f32 %v2279_v33, %v2278_v25  ;;  %v2281_v31 = vpop.f32.mrb[26].mxu0 }
 0x4d1   :  { %v2282_v55 = vpop.f32.mrb[27].mxu0 }
 0x4d2   :  { %v1916_v30 = vadd.f32 %v2280_v14, %v2204_v36 }
 0x4ea   :  { %v2300_v50 = vpop.f32.mrb[36].mxu1 }
 0x4eb   :  { %v2301_v18 = vpop.f32.mrb[37].mxu1 }
 0x4ec   :  { %v2302_v42 = vadd.f32 %v2301_v18, %v2300_v50  ;;  %v2303_v34 = vpop.f32.mrb[38].mxu1 }
 0x4ed   :  { %v2304_v16 = vpop.f32.mrb[39].mxu1 }
 0x4ee   :  { %v1956_v39 = vadd.f32 %v2302_v42, %v1916_v30  ;;  %v1995_v63 = vpop.f32.mrb[28].mxu0 }
 0x4ef   :  { %v2366_v44 = vpop.f32.mrb[29].mxu0 }
 0x4f0   :  { %v1996_v46 = vadd.f32 %v1995_v63, %v1956_v39  ;;  %v1998_v43 = vpop.f32.mrb[30].mxu0 }
 0x4f1   :  { %v2367_v40 = vpop.f32.mrb[31].mxu0 }
 0x4f2   :  { %v2001_v45 = vmax.f32 %v1996_v46, 0.0 }
 0x4f4   :  { %v2002_v35 = vpack.c.bf16 %v2001_v45, %v2001_v45 }
 0x4f6   :  { %2377 = vmatmul.mubr.msk.bf16.vlgmr.msra.gmra.mrb[40].mxu1 %vm1209_vm12, %v2002_v35 }
 0x5c9   :  { %v2079_v28 = vpop.f32.mrb[40].mxu1 }
 0x5ca   :  { %v2080_v49 = vadd.f32 %v2245_v20, %v2079_v28  ;;  %v2378_v53 = vpop.f32.mrb[41].mxu1 }
 0x5cb   :  { %v2082_v19 = vpop.f32.mrb[42].mxu1 }
 0x5cc   :  { %v2085_v37 = vsel %vm1246_vm10, %v2080_v49, -inf  ;;  %v2379_v3 = vpop.f32.mrb[43].mxu1 }
 0x5cd   :  { %v2086_v48 = vrot.slane %v2085_v37, 4 }
 0x5cf   :  { %v2087_v23 = vmax.f32 %v2085_v37, %v2086_v48 }
 0x5d1   :  { %v2088_v62 = vrot.slane %v2087_v23, 2 }
 0x5d3   :  { %v2089_v27 = vmax.f32 %v2087_v23, %v2088_v62 }
 0x5d5   :  { %v2090_v4 = vrot.slane %v2089_v27, 1 }
 0x5d7   :  { %v2091_v5 = vmax.f32 %v2089_v27, %v2090_v4 }
 0x5d9   :  { %v2092_v32 = vsub.f32 %v2080_v49, %v2091_v5 }
 0x5db   :  { %v2093_v52 = vmul.f32 1.442695, %v2092_v32 }
 0x5dd   :  { %2618 = vpow2.f32 %v2093_v52 }
 0x5e7   :  { %v2619_v1 = vpop.eup %2618 }
 0x5e8   :  { %v2095_v60 = vsel %vm1246_vm10, %v2619_v1, 0.0 }
 0x5e9   :  { %v2096_v54 = vrot.slane %v2095_v60, 4 }
 0x5eb   :  { %v2097_v58 = vadd.f32 %v2096_v54, %v2095_v60 }
 0x5ed   :  { %v2098_v57 = vrot.slane %v2097_v58, 2 }
 0x5ef   :  { %v2099_v47 = vadd.f32 %v2098_v57, %v2097_v58 }
 0x5f1   :  { %v2100_v6 = vrot.slane %v2099_v47, 1 }
 0x5f3   :  { %v2101_v51 = vadd.f32 %v2100_v6, %v2099_v47 }
 0x5f5   :  { %2620 = vlog2.f32 %v2101_v51 }
 0x5ff   :  { %v2621_v0 = vpop.eup %2620 }
 0x600   :  { %v2103_v7 = vmul.f32 0.6931472, %v2621_v0 }
 0x602   :  { %v2104_v8 = vadd.f32 %v2103_v7, %v2091_v5 }
 0x604   :  { %v2105_v10 = vsub.f32 %v2080_v49, %v2104_v8 }
 0x606   :  { %2106 = vst [vmem:[#allocation2] sm:$0x3] %v2105_v10 }
 0x607   :  { %2633 = shalt.err (!%p2630_p4)
}
 0x608   :  { %s2634_s25 = scalar_lea.hbm %s3602_s9, 32 }
 0x609   :  { %p2635_p5 = scmp.ne.s32.totalorder %s3602_s9, %s2634_s25  ;;  %p2638_p6 = scmp.lt.u32.totalorder %s2634_s25, %s3602_s9 }
 0x60b   :  { %p2640_p7 = pnand %p2638_p6, %p2635_p5 }
 0x60d   :  { %2643 = shalt.err (!%p2640_p7)
}
 0x60e   :  { %2116 = dma.vmem_to_hbm [thread:$0]  %s2114_s8, 32, %s3602_s9, [#allocation3]  }
 0x60f   :  { %2644 = dma.done.wait [#allocation3], 32  }
 0x610   :  { %2645 = vsyncadd [#allocation3], 4294967264 }
 0x611   :  { %2120 = vsyncpa [#allocation3], 1 }

</bundles_post_ra>
